<compile_context>
chip_gen: v7x
topology: tpu7x:2x2x1
jax: 0.10.0
libtpu: 0.0.40
codegen_flags: <defaults>
</compile_context>

<pallas_src>
import functools

import jax
import jax.numpy as jnp
from jax.experimental import pallas as pl
from jax.experimental.pallas import tpu as pltpu

LABEL_DIM = 5            # num_classes
FEATURE_DIM = 5
EMB_DIM = 128
HIDDEN = 128
FUSED_IN = FEATURE_DIM + LABEL_DIM        # 10
FUSED_OUT = 2 * HIDDEN                    # 256
LN_EPS = 1e-5
NEG_BIG = -1e30
VMEM_LIMIT_BYTES = 32 * 1024 * 1024       # v7x-safe scoped VMEM budget
_HI = jax.lax.Precision.HIGHEST


def _round_up(x, m):
    return ((x + m - 1) // m) * m


def _layernorm(x, gamma, beta):
    # PyTorch LayerNorm over the last dim, biased variance, eps=1e-5.
    mean = jnp.mean(x, axis=-1, keepdims=True)
    var = jnp.mean((x - mean) * (x - mean), axis=-1, keepdims=True)
    inv = jax.lax.rsqrt(var + LN_EPS)
    return (x - mean) * inv * gamma + beta


# ----------------------------------------------------------------------------
# Pass 1: online-softmax statistics over both branches of all batch tiles.
# ----------------------------------------------------------------------------
def _stats_kernel(
    nvalid_ref,   # SMEM (1,) int32  -- true batch size (scalar prefetch)
    feats_ref,    # (TB, 10) f32     -- features in lanes 0..4, zeros in 5..9
    lab_ref,      # (TB, 1)  int32
    w01_ref,      # (10, 256) f32    -- block-diag [[w_feat, 0], [0, emb_ln]]
    b01_ref,      # (1, 256)  f32    -- [b_feat | 0]
    g1_ref,       # (1, 128)  f32    -- feature_norm gamma
    be1_ref,      # (1, 128)  f32    -- feature_norm beta
    wca_ref,      # (1, 128)  f32    -- cross_attention weight (row layout)
    s_ref,        # out (1, 128) f32 -- running sum_j exp(l_j - m) * row_j
    z_ref,        # out (1, 1)   f32 -- running sum_j exp(l_j - m)
    m_sc,         # scratch VMEM (1, 1) f32 -- running max
):
    i = pl.program_id(0)
    tb = feats_ref.shape[0]

    @pl.when(i == 0)
    def _():
        s_ref[...] = jnp.zeros_like(s_ref)
        z_ref[...] = jnp.zeros_like(z_ref)
        m_sc[...] = jnp.full(m_sc.shape, NEG_BIG, m_sc.dtype)

    # Fused feature Linear + (pre-LayerNormed) embedding lookup:
    # one (TB,10) @ (10,256) matmul.
    lab = lab_ref[...]                                                 # (TB, 1)
    onehot10 = (
        jax.lax.broadcasted_iota(jnp.int32, (tb, FUSED_IN), 1)
        == (lab + FEATURE_DIM)
    ).astype(jnp.float32)
    combined = feats_ref[...] + onehot10                               # (TB, 10)
    xle = jnp.dot(combined, w01_ref[...],
                  preferred_element_type=jnp.float32) + b01_ref[...]   # (TB, 256)
    x = _layernorm(xle[:, :HIDDEN], g1_ref[...], be1_ref[...])         # (TB, 128)
    le = xle[:, HIDDEN:]      # already layer-normalized (emb table pre-LN'd)

    # Per-branch attention logits, lane-dense (1, TB), via NT matmuls (no concat).
    # cross_attention bias is omitted: softmax over dim 0 is shift-invariant.
    nt = (((1,), (1,)), ((), ()))
    logit_x = jax.lax.dot_general(wca_ref[...], x, nt,
                                  preferred_element_type=jnp.float32)  # (1, TB)
    logit_l = jax.lax.dot_general(wca_ref[...], le, nt,
                                  preferred_element_type=jnp.float32)  # (1, TB)

    # Mask padded rows (batch was padded up to a multiple of the tile size).
    rows = jax.lax.broadcasted_iota(jnp.int32, (1, tb), 1) + i * tb
    valid = rows < nvalid_ref[0]
    logit_x = jnp.where(valid, logit_x, NEG_BIG)
    logit_l = jnp.where(valid, logit_l, NEG_BIG)

    # Online softmax update.
    m_old = m_sc[...]                                                  # (1, 1)
    tile_max = jnp.maximum(jnp.max(logit_x, axis=1, keepdims=True),
                           jnp.max(logit_l, axis=1, keepdims=True))
    m_new = jnp.maximum(m_old, tile_max)
    alpha = jnp.exp(m_old - m_new)
    px = jnp.exp(logit_x - m_new)                                      # (1, TB)
    pe = jnp.exp(logit_l - m_new)                                      # (1, TB)
    z_ref[...] = alpha * z_ref[...] + (jnp.sum(px, axis=1, keepdims=True)
                                       + jnp.sum(pe, axis=1, keepdims=True))
    # Weighted row sums on the MXU: (1,TB) @ (TB,128).
    sx = jnp.dot(px, x, preferred_element_type=jnp.float32)
    sl = jnp.dot(pe, le, preferred_element_type=jnp.float32)
    s_ref[...] = alpha * s_ref[...] + sx + sl
    m_sc[...] = m_new


# ----------------------------------------------------------------------------
# Pass 2: lane-dense per-row reward gather  out[i] = table[label[i]].
# ----------------------------------------------------------------------------
def _gather_kernel(lab_ref, table_ref, out_ref):
    # lab_ref:   (1, TB) int32 (VMEM, lane-dense)
    # table_ref: (1, 5) f32 in SMEM (post-sigmoid per-class rewards)
    # out_ref:   (1, TB) f32 (lane-dense full-vreg stores)
    lab = lab_ref[...]
    r = jnp.zeros(lab.shape, jnp.float32)
    for c in range(LABEL_DIM):                 # 5-way select chain on the VPU
        r = jnp.where(lab == c, table_ref[0, c], r)
    out_ref[...] = r                           # padded rows get table[0]; trimmed


# ----------------------------------------------------------------------------
# Wrapper
# ----------------------------------------------------------------------------
@functools.partial(jax.jit, static_argnames=("block_b",))
def rewarder_forward(features, label_indices, params, *, block_b=2048):
    """features: (B, 5) f32 ; label_indices: (B,) int -> (B, 1) f32."""
    (w_feat, b_feat, g1, be1, emb, g2, be2, w_ca, b_ca,
     w_m1, b_m1, w_m2, b_m2, w_f1, b_f1, w_f2, b_f2) = params
    del b_ca  # softmax over dim 0 is invariant to a constant logit shift

    B = features.shape[0]
    # Tile is always a multiple of 128 so (1,TB) logit/output rows are lane-dense.
    tb = _round_up(min(block_b, B), 128)
    b_pad = _round_up(B, tb)
    n_tiles = b_pad // tb

    # Padded inputs.
    feats10 = jnp.zeros((b_pad, FUSED_IN), jnp.float32)
    feats10 = feats10.at[:B, :FEATURE_DIM].set(features.astype(jnp.float32))
    lab_i32 = label_indices.astype(jnp.int32)
    labels_col = jnp.zeros((b_pad, 1), jnp.int32).at[:B, 0].set(lab_i32)
    labels_row = jnp.zeros((1, b_pad), jnp.int32).at[0, :B].set(lab_i32)
    nvalid = jnp.array([B], jnp.int32)

    # Pre-LayerNorm the 5-row embedding table once (LN is row-wise; the one-hot
    # matmul in pass 1 just gathers rows, so this is exact).
    emb_ln = _layernorm(emb, g2, be2)                                 # (5, 128)

    # Fused block-diagonal first-layer weight: [feats | onehot] @ [[W_f,0],[0,emb_ln]].
    w01 = jnp.zeros((FUSED_IN, FUSED_OUT), jnp.float32)
    w01 = w01.at[:FEATURE_DIM, :HIDDEN].set(w_feat)
    w01 = w01.at[FEATURE_DIM:, HIDDEN:].set(emb_ln)
    b01 = jnp.concatenate([b_feat, jnp.zeros((1, HIDDEN), jnp.float32)], axis=1)
    wca_row = jnp.transpose(w_ca)                                     # (1, 128)

    # ---- pass 1: online-softmax statistics --------------------------------
    # TODO(synk): on v7x the batch reduction could be sharded across the two
    # TensorCores (grid (2, n_tiles//2) + partial-stat merge); kept single-core
    # here for portability across v5e/v6e/v7x.
    stats_grid = pltpu.PrefetchScalarGridSpec(
        num_scalar_prefetch=1,
        grid=(n_tiles,),
        in_specs=[
            pl.BlockSpec((tb, FUSED_IN), lambda i, n: (i, 0)),        # feats10
            pl.BlockSpec((tb, 1), lambda i, n: (i, 0)),               # labels
            pl.BlockSpec((FUSED_IN, FUSED_OUT), lambda i, n: (0, 0)), # w01
            pl.BlockSpec((1, FUSED_OUT), lambda i, n: (0, 0)),        # b01
            pl.BlockSpec((1, HIDDEN), lambda i, n: (0, 0)),           # g1
            pl.BlockSpec((1, HIDDEN), lambda i, n: (0, 0)),           # be1
            pl.BlockSpec((1, HIDDEN), lambda i, n: (0, 0)),           # wca_row
        ],
        out_specs=(
            pl.BlockSpec((1, HIDDEN), lambda i, n: (0, 0)),           # S accumulator
            pl.BlockSpec((1, 1), lambda i, n: (0, 0)),                # Z accumulator
        ),
        scratch_shapes=[pltpu.VMEM((1, 1), jnp.float32)],             # running max
    )
    s, z = pl.pallas_call(
        _stats_kernel,
        out_shape=(jax.ShapeDtypeStruct((1, HIDDEN), jnp.float32),
                   jax.ShapeDtypeStruct((1, 1), jnp.float32)),
        grid_spec=stats_grid,
        compiler_params=pltpu.CompilerParams(
            dimension_semantics=("arbitrary",),
            vmem_limit_bytes=VMEM_LIMIT_BYTES),
    )(nvalid, feats10, labels_col, w01, b01, g1, be1, wca_row)

    # ---- tiny per-class head (plain JAX, 5 rows) ---------------------------
    # mlp_input = ca + LN(emb[label]) depends only on the label index, so the
    # whole MLP/FFN head is evaluated once per class -> 5-entry reward table.
    ca = s / z                                                        # exact divide
    mlp_in5 = ca + emb_ln                                             # (5, 128)
    h = jax.nn.relu(jnp.dot(mlp_in5, w_m1, precision=_HI) + b_m1)     # (5, 256)
    h = jnp.dot(h, w_m2, precision=_HI) + b_m2                        # (5, 128)
    f = jax.nn.relu(jnp.dot(h, w_f1, precision=_HI) + b_f1)           # (5, 64)
    table = jax.nn.sigmoid(jnp.dot(f, w_f2, precision=_HI) + b_f2)    # (5, 1)
    table_row = table.reshape(1, LABEL_DIM)

    # ---- pass 2: lane-dense gather of per-row rewards ----------------------
    head_grid = pltpu.PrefetchScalarGridSpec(
        num_scalar_prefetch=0,
        grid=(n_tiles,),
        in_specs=[
            pl.BlockSpec((1, tb), lambda i: (0, i)),                  # labels row
            pl.BlockSpec(memory_space=pltpu.MemorySpace.SMEM),        # reward table
        ],
        out_specs=pl.BlockSpec((1, tb), lambda i: (0, i)),
    )
    out_row = pl.pallas_call(
        _gather_kernel,
        out_shape=jax.ShapeDtypeStruct((1, b_pad), jnp.float32),
        grid_spec=head_grid,
        compiler_params=pltpu.CompilerParams(
            dimension_semantics=("parallel",),
            vmem_limit_bytes=VMEM_LIMIT_BYTES),
    )(labels_row, table_row)

    return out_row[0, :B].reshape(B, 1)


# ----------------------------------------------------------------------------
# Parameters and reference
# ----------------------------------------------------------------------------
def init_params(key):
    """Deterministic synthetic parameters matching Rewarder.__init__ shapes."""
    ks = jax.random.split(key, 10)

    def lin(k, fan_in, fan_out):
        w = jax.random.normal(k, (fan_in, fan_out), jnp.float32) * (1.0 / jnp.sqrt(fan_in))
        b = jnp.zeros((1, fan_out), jnp.float32)
        return w, b

    w_feat, b_feat = lin(ks[0], FEATURE_DIM, HIDDEN)          # feature_fc
    g1 = jnp.ones((1, HIDDEN), jnp.float32)                   # feature_norm
    be1 = jnp.zeros((1, HIDDEN), jnp.float32)
    emb = jax.random.normal(ks[1], (LABEL_DIM, EMB_DIM), jnp.float32)  # label_embedding
    g2 = jnp.ones((1, EMB_DIM), jnp.float32)                  # label_norm
    be2 = jnp.zeros((1, EMB_DIM), jnp.float32)
    w_ca, b_ca = lin(ks[2], HIDDEN, 1)                        # cross_attention_fc
    w_m1, b_m1 = lin(ks[3], HIDDEN, 256)                      # mlp_fc1
    w_m2, b_m2 = lin(ks[4], 256, HIDDEN)                      # mlp_fc2
    w_f1, b_f1 = lin(ks[5], HIDDEN, 64)                       # ffn_fc1
    w_f2, b_f2 = lin(ks[6], 64, 1)                            # ffn_fc2
    return (w_feat, b_feat, g1, be1, emb, g2, be2, w_ca, b_ca,
            w_m1, b_m1, w_m2, b_m2, w_f1, b_f1, w_f2, b_f2)


def reference_forward(features, label_indices, params):
    """Pure f32 (HIGHEST-precision matmuls) port of the PyTorch module."""
    (w_feat, b_feat, g1, be1, emb, g2, be2, w_ca, b_ca,
     w_m1, b_m1, w_m2, b_m2, w_f1, b_f1, w_f2, b_f2) = params
    x = _layernorm(jnp.dot(features, w_feat, precision=_HI) + b_feat, g1, be1)
    le = _layernorm(emb[label_indices], g2, be2)
    cat = jnp.concatenate([x, le], axis=0)
    logits = jnp.dot(cat, w_ca, precision=_HI) + b_ca
    attn = jax.nn.softmax(logits, axis=0)
    ca = jnp.sum(attn * cat, axis=0, keepdims=True)
    mlp_in = ca + le
    h = jax.nn.relu(jnp.dot(mlp_in, w_m1, precision=_HI) + b_m1)
    h = jnp.dot(h, w_m2, precision=_HI) + b_m2
    f = jax.nn.relu(jnp.dot(h, w_f1, precision=_HI) + b_f1)
    return jax.nn.sigmoid(jnp.dot(f, w_f2, precision=_HI) + b_f2)


if __name__ == "__main__":
    B = 260
    key = jax.random.PRNGKey(0)
    k_param, k_gen, k_real = jax.random.split(key, 3)

    params = init_params(k_param)

    # generated_label -> one-hot features (B, 5); real labels -> int indices (B,)
    generated_label = jax.random.randint(k_gen, (B,), 0, LABEL_DIM)
    features = jax.nn.one_hot(generated_label, LABEL_DIM, dtype=jnp.float32)
    real_labels = jax.random.randint(k_real, (B,), 0, LABEL_DIM).astype(jnp.int32)

    # block_b=128 with B=260 exercises a 3-tile grid plus the padded-row masking.
    reward = rewarder_forward(features, real_labels, params, block_b=128)
    reward = jax.block_until_ready(reward)

    ref = reference_forward(features, real_labels, params)

    assert reward.shape == (B, 1)
    assert bool(jnp.all(jnp.isfinite(reward)))
    max_diff = float(jnp.max(jnp.abs(reward - ref)))
    assert max_diff < 5e-3, f"max abs diff vs f32 reference: {max_diff}"
    print("KERNEL_OK")
</pallas_src>

<mosaic_0001>
module attributes {stable_mosaic.version = 11 : i64} {
  func.func @_stats_kernel(%arg0: i32, %arg1: memref<1xi32, #tpu.memory_space<smem>>, %arg2: memref<128x10xf32, #tpu.memory_space<vmem>>, %arg3: memref<128x1xi32, #tpu.memory_space<vmem>>, %arg4: memref<10x256xf32, #tpu.memory_space<vmem>>, %arg5: memref<1x256xf32, #tpu.memory_space<vmem>>, %arg6: memref<1x128xf32, #tpu.memory_space<vmem>>, %arg7: memref<1x128xf32, #tpu.memory_space<vmem>>, %arg8: memref<1x128xf32, #tpu.memory_space<vmem>>, %arg9: memref<1x128xf32, #tpu.memory_space<vmem>>, %arg10: memref<1x1xf32, #tpu.memory_space<vmem>>, %arg11: memref<1x1xf32, #tpu.memory_space<vmem>>) attributes {dimension_semantics = [#tpu.dimension_semantics<arbitrary>], iteration_bounds = array<i64: 3>, scalar_prefetch = 1 : i64, scratch_operands = 1 : i64, tpu.core_type = #tpu.core_type<tc>, window_params = [{transform_indices = @transform_0, window_bounds = array<i64: 128, 10>}, {transform_indices = @transform_1, window_bounds = array<i64: 128, 1>}, {pipeline_mode = #tpu.pipeline_mode<synchronous>, transform_indices = @transform_2, window_bounds = array<i64: 10, 256>}, {pipeline_mode = #tpu.pipeline_mode<synchronous>, transform_indices = @transform_3, window_bounds = array<i64: 1, 256>}, {pipeline_mode = #tpu.pipeline_mode<synchronous>, transform_indices = @transform_4, window_bounds = array<i64: 1, 128>}, {pipeline_mode = #tpu.pipeline_mode<synchronous>, transform_indices = @transform_5, window_bounds = array<i64: 1, 128>}, {pipeline_mode = #tpu.pipeline_mode<synchronous>, transform_indices = @transform_6, window_bounds = array<i64: 1, 128>}, {pipeline_mode = #tpu.pipeline_mode<synchronous>, transform_indices = @transform_7, window_bounds = array<i64: 1, 128>}, {pipeline_mode = #tpu.pipeline_mode<synchronous>, transform_indices = @transform_8, window_bounds = array<i64: 1, 1>}]} {
    %c0_i32 = arith.constant 0 : i32
    %0 = arith.cmpi eq, %arg0, %c0_i32 : i32
    %1 = arith.extui %0 : i1 to i32
    %c0_i32_0 = arith.constant 0 : i32
    %2 = arith.cmpi ne, %1, %c0_i32_0 : i32
    scf.if %2 {
      %cst_44 = arith.constant 0.000000e+00 : f32
      %94 = vector.broadcast %cst_44 : f32 to vector<1x128xf32>
      %c0_45 = arith.constant 0 : index
      %c0_46 = arith.constant 0 : index
      %95 = vector.load %arg9[%c0_45, %c0_46] : memref<1x128xf32, #tpu.memory_space<vmem>>, vector<1x128xf32>
      tpu.vector_store %arg9[%c0_45, %c0_46], %94 {strides = array<i32>} : memref<1x128xf32, #tpu.memory_space<vmem>>, vector<1x128xf32>,
      %cst_47 = arith.constant 0.000000e+00 : f32
      %96 = vector.broadcast %cst_47 : f32 to vector<1x1xf32>
      %c0_48 = arith.constant 0 : index
      %c0_49 = arith.constant 0 : index
      %97 = vector.load %arg10[%c0_48, %c0_49] : memref<1x1xf32, #tpu.memory_space<vmem>>, vector<1x1xf32>
      tpu.vector_store %arg10[%c0_48, %c0_49], %96 {strides = array<i32>} : memref<1x1xf32, #tpu.memory_space<vmem>>, vector<1x1xf32>,
      %cst_50 = arith.constant -1.000000e+30 : f32
      %98 = vector.broadcast %cst_50 : f32 to vector<1x1xf32>
      %c0_51 = arith.constant 0 : index
      %c0_52 = arith.constant 0 : index
      %99 = vector.load %arg11[%c0_51, %c0_52] : memref<1x1xf32, #tpu.memory_space<vmem>>, vector<1x1xf32>
      tpu.vector_store %arg11[%c0_51, %c0_52], %98 {strides = array<i32>} : memref<1x1xf32, #tpu.memory_space<vmem>>, vector<1x1xf32>,
    } else {
    }
    %c0 = arith.constant 0 : index
    %c0_1 = arith.constant 0 : index
    %3 = vector.load %arg3[%c0, %c0_1] : memref<128x1xi32, #tpu.memory_space<vmem>>, vector<128x1xi32>
    %4 = tpu.iota {dimensions = array<i32: 1>} : vector<128x10xi32>
    %c5_i32 = arith.constant 5 : i32
    %5 = vector.broadcast %c5_i32 : i32 to vector<128x1xi32>
    %6 = arith.addi %3, %5 : vector<128x1xi32>
    %7 = vector.broadcast %6 : vector<128x1xi32> to vector<128x10xi32>
    %8 = arith.cmpi eq, %4, %7 : vector<128x10xi32>
    %9 = arith.extui %8 : vector<128x10xi1> to vector<128x10xi32>
    %10 = arith.sitofp %9 : vector<128x10xi32> to vector<128x10xf32>
    %c0_2 = arith.constant 0 : index
    %c0_3 = arith.constant 0 : index
    %11 = vector.load %arg2[%c0_2, %c0_3] : memref<128x10xf32, #tpu.memory_space<vmem>>, vector<128x10xf32>
    %12 = arith.addf %11, %10 : vector<128x10xf32>
    %c0_4 = arith.constant 0 : index
    %c0_5 = arith.constant 0 : index
    %13 = vector.load %arg4[%c0_4, %c0_5] : memref<10x256xf32, #tpu.memory_space<vmem>>, vector<10x256xf32>
    %cst = arith.constant dense<0.000000e+00> : vector<128x256xf32>
    %14 = tpu.matmul %12, %13, %cst {dimension_numbers = #tpu.dot_dimension_numbers<[1], [0], [0], [1], [0, 0, 1, 1], [], []>} : vector<128x10xf32>, vector<10x256xf32>, vector<128x256xf32> -> vector<128x256xf32>
    %c0_6 = arith.constant 0 : index
    %c0_7 = arith.constant 0 : index
    %15 = vector.load %arg5[%c0_6, %c0_7] : memref<1x256xf32, #tpu.memory_space<vmem>>, vector<1x256xf32>
    %16 = vector.broadcast %15 : vector<1x256xf32> to vector<128x256xf32>
    %17 = arith.addf %14, %16 : vector<128x256xf32>
    %18 = vector.extract_strided_slice %17 {offsets = [0, 0], sizes = [128, 128], strides = [1, 1]} : vector<128x256xf32> to vector<128x128xf32>
    %c0_8 = arith.constant 0 : index
    %c0_9 = arith.constant 0 : index
    %19 = vector.load %arg6[%c0_8, %c0_9] : memref<1x128xf32, #tpu.memory_space<vmem>>, vector<1x128xf32>
    %c0_10 = arith.constant 0 : index
    %c0_11 = arith.constant 0 : index
    %20 = vector.load %arg7[%c0_10, %c0_11] : memref<1x128xf32, #tpu.memory_space<vmem>>, vector<1x128xf32>
    %cst_12 = arith.constant dense<0.000000e+00> : vector<128xf32>
    %21 = vector.multi_reduction <add>, %18, %cst_12 [1] : vector<128x128xf32> to vector<128xf32>
    %22 = vector.shape_cast %21 : vector<128xf32> to vector<128x1xf32>
    %cst_13 = arith.constant 1.280000e+02 : f32
    %23 = vector.broadcast %cst_13 : f32 to vector<128x1xf32>
    %24 = arith.divf %22, %23 : vector<128x1xf32>
    %25 = vector.broadcast %24 : vector<128x1xf32> to vector<128x128xf32>
    %26 = arith.subf %18, %25 : vector<128x128xf32>
    %27 = vector.broadcast %24 : vector<128x1xf32> to vector<128x128xf32>
    %28 = arith.subf %18, %27 : vector<128x128xf32>
    %29 = arith.mulf %26, %28 : vector<128x128xf32>
    %cst_14 = arith.constant dense<0.000000e+00> : vector<128xf32>
    %30 = vector.multi_reduction <add>, %29, %cst_14 [1] : vector<128x128xf32> to vector<128xf32>
    %31 = vector.shape_cast %30 : vector<128xf32> to vector<128x1xf32>
    %cst_15 = arith.constant 1.280000e+02 : f32
    %32 = vector.broadcast %cst_15 : f32 to vector<128x1xf32>
    %33 = arith.divf %31, %32 : vector<128x1xf32>
    %cst_16 = arith.constant 9.99999974E-6 : f32
    %34 = vector.broadcast %cst_16 : f32 to vector<128x1xf32>
    %35 = arith.addf %33, %34 : vector<128x1xf32>
    %36 = math.rsqrt %35 : vector<128x1xf32>
    %37 = vector.broadcast %24 : vector<128x1xf32> to vector<128x128xf32>
    %38 = arith.subf %18, %37 : vector<128x128xf32>
    %39 = vector.broadcast %36 : vector<128x1xf32> to vector<128x128xf32>
    %40 = arith.mulf %38, %39 : vector<128x128xf32>
    %41 = vector.broadcast %19 : vector<1x128xf32> to vector<128x128xf32>
    %42 = arith.mulf %40, %41 : vector<128x128xf32>
    %43 = vector.broadcast %20 : vector<1x128xf32> to vector<128x128xf32>
    %44 = arith.addf %42, %43 : vector<128x128xf32>
    %45 = vector.extract_strided_slice %17 {offsets = [0, 128], sizes = [128, 128], strides = [1, 1]} : vector<128x256xf32> to vector<128x128xf32>
    %c0_17 = arith.constant 0 : index
    %c0_18 = arith.constant 0 : index
    %46 = vector.load %arg8[%c0_17, %c0_18] : memref<1x128xf32, #tpu.memory_space<vmem>>, vector<1x128xf32>
    %cst_19 = arith.constant dense<0.000000e+00> : vector<1x128xf32>
    %47 = tpu.matmul %46, %44, %cst_19 {dimension_numbers = #tpu.dot_dimension_numbers<[1], [1], [0], [0], [0, 0, 1, 0], [], []>} : vector<1x128xf32>, vector<128x128xf32>, vector<1x128xf32> -> vector<1x128xf32>
    %c0_20 = arith.constant 0 : index
    %c0_21 = arith.constant 0 : index
    %48 = vector.load %arg8[%c0_20, %c0_21] : memref<1x128xf32, #tpu.memory_space<vmem>>, vector<1x128xf32>
    %cst_22 = arith.constant dense<0.000000e+00> : vector<1x128xf32>
    %49 = tpu.matmul %48, %45, %cst_22 {dimension_numbers = #tpu.dot_dimension_numbers<[1], [1], [0], [0], [0, 0, 1, 0], [], []>} : vector<1x128xf32>, vector<128x128xf32>, vector<1x128xf32> -> vector<1x128xf32>
    %50 = tpu.iota {dimensions = array<i32: 1>} : vector<1x128xi32>
    %c128_i32 = arith.constant 128 : i32
    %51 = arith.muli %arg0, %c128_i32 : i32
    %52 = vector.broadcast %51 : i32 to vector<1x128xi32>
    %53 = arith.addi %50, %52 : vector<1x128xi32>
    %c0_23 = arith.constant 0 : index
    %54 = memref.load %arg1[%c0_23] : memref<1xi32, #tpu.memory_space<smem>>
    %55 = vector.broadcast %54 : i32 to vector<1x128xi32>
    %56 = arith.cmpi slt, %53, %55 : vector<1x128xi32>
    %cst_24 = arith.constant -1.000000e+30 : f32
    %57 = vector.broadcast %cst_24 : f32 to vector<1x128xf32>
    %58 = arith.select %56, %47, %57 : vector<1x128xi1>, vector<1x128xf32>
    %cst_25 = arith.constant -1.000000e+30 : f32
    %59 = vector.broadcast %cst_25 : f32 to vector<1x128xf32>
    %60 = arith.select %56, %49, %59 : vector<1x128xi1>, vector<1x128xf32>
    %c0_26 = arith.constant 0 : index
    %c0_27 = arith.constant 0 : index
    %61 = vector.load %arg11[%c0_26, %c0_27] : memref<1x1xf32, #tpu.memory_space<vmem>>, vector<1x1xf32>
    %cst_28 = arith.constant dense<0xFF800000> : vector<1xf32>
    %62 = vector.multi_reduction <maximumf>, %58, %cst_28 [1] : vector<1x128xf32> to vector<1xf32>
    %63 = vector.shape_cast %62 : vector<1xf32> to vector<1x1xf32>
    %cst_29 = arith.constant dense<0xFF800000> : vector<1xf32>
    %64 = vector.multi_reduction <maximumf>, %60, %cst_29 [1] : vector<1x128xf32> to vector<1xf32>
    %65 = vector.shape_cast %64 : vector<1xf32> to vector<1x1xf32>
    %66 = arith.maximumf %63, %65 : vector<1x1xf32>
    %67 = arith.maximumf %61, %66 : vector<1x1xf32>
    %68 = arith.subf %61, %67 : vector<1x1xf32>
    %69 = math.exp %68 : vector<1x1xf32>
    %70 = vector.broadcast %67 : vector<1x1xf32> to vector<1x128xf32>
    %71 = arith.subf %58, %70 : vector<1x128xf32>
    %72 = math.exp %71 : vector<1x128xf32>
    %73 = vector.broadcast %67 : vector<1x1xf32> to vector<1x128xf32>
    %74 = arith.subf %60, %73 : vector<1x128xf32>
    %75 = math.exp %74 : vector<1x128xf32>
    %c0_30 = arith.constant 0 : index
    %c0_31 = arith.constant 0 : index
    %76 = vector.load %arg10[%c0_30, %c0_31] : memref<1x1xf32, #tpu.memory_space<vmem>>, vector<1x1xf32>
    %77 = arith.mulf %69, %76 : vector<1x1xf32>
    %cst_32 = arith.constant dense<0.000000e+00> : vector<1xf32>
    %78 = vector.multi_reduction <add>, %72, %cst_32 [1] : vector<1x128xf32> to vector<1xf32>
    %79 = vector.shape_cast %78 : vector<1xf32> to vector<1x1xf32>
    %cst_33 = arith.constant dense<0.000000e+00> : vector<1xf32>
    %80 = vector.multi_reduction <add>, %75, %cst_33 [1] : vector<1x128xf32> to vector<1xf32>
    %81 = vector.shape_cast %80 : vector<1xf32> to vector<1x1xf32>
    %82 = arith.addf %79, %81 : vector<1x1xf32>
    %83 = arith.addf %77, %82 : vector<1x1xf32>
    %c0_34 = arith.constant 0 : index
    %c0_35 = arith.constant 0 : index
    %84 = vector.load %arg10[%c0_34, %c0_35] : memref<1x1xf32, #tpu.memory_space<vmem>>, vector<1x1xf32>
    tpu.vector_store %arg10[%c0_34, %c0_35], %83 {strides = array<i32>} : memref<1x1xf32, #tpu.memory_space<vmem>>, vector<1x1xf32>,
    %cst_36 = arith.constant dense<0.000000e+00> : vector<1x128xf32>
    %85 = tpu.matmul %72, %44, %cst_36 {dimension_numbers = #tpu.dot_dimension_numbers<[1], [0], [0], [1], [0, 0, 1, 1], [], []>} : vector<1x128xf32>, vector<128x128xf32>, vector<1x128xf32> -> vector<1x128xf32>
    %cst_37 = arith.constant dense<0.000000e+00> : vector<1x128xf32>
    %86 = tpu.matmul %75, %45, %cst_37 {dimension_numbers = #tpu.dot_dimension_numbers<[1], [0], [0], [1], [0, 0, 1, 1], [], []>} : vector<1x128xf32>, vector<128x128xf32>, vector<1x128xf32> -> vector<1x128xf32>
    %c0_38 = arith.constant 0 : index
    %c0_39 = arith.constant 0 : index
    %87 = vector.load %arg9[%c0_38, %c0_39] : memref<1x128xf32, #tpu.memory_space<vmem>>, vector<1x128xf32>
    %88 = vector.broadcast %69 : vector<1x1xf32> to vector<1x128xf32>
    %89 = arith.mulf %88, %87 : vector<1x128xf32>
    %90 = arith.addf %89, %85 : vector<1x128xf32>
    %91 = arith.addf %90, %86 : vector<1x128xf32>
    %c0_40 = arith.constant 0 : index
    %c0_41 = arith.constant 0 : index
    %92 = vector.load %arg9[%c0_40, %c0_41] : memref<1x128xf32, #tpu.memory_space<vmem>>, vector<1x128xf32>
    tpu.vector_store %arg9[%c0_40, %c0_41], %91 {strides = array<i32>} : memref<1x128xf32, #tpu.memory_space<vmem>>, vector<1x128xf32>,
    %c0_42 = arith.constant 0 : index
    %c0_43 = arith.constant 0 : index
    %93 = vector.load %arg11[%c0_42, %c0_43] : memref<1x1xf32, #tpu.memory_space<vmem>>, vector<1x1xf32>
    tpu.vector_store %arg11[%c0_42, %c0_43], %67 {strides = array<i32>} : memref<1x1xf32, #tpu.memory_space<vmem>>, vector<1x1xf32>,
    return
  }
  func.func @transform_0(%arg0: i32, %arg1: memref<1xi32, #tpu.memory_space<smem>>) -> (i32, i32) {
    %c0_i32 = arith.constant 0 : i32
    %c0_i32_0 = arith.constant 0 : i32
    return %arg0, %c0_i32 : i32, i32
  }
  func.func @transform_1(%arg0: i32, %arg1: memref<1xi32, #tpu.memory_space<smem>>) -> (i32, i32) {
    %c0_i32 = arith.constant 0 : i32
    %c0_i32_0 = arith.constant 0 : i32
    return %arg0, %c0_i32 : i32, i32
  }
  func.func @transform_2(%arg0: i32, %arg1: memref<1xi32, #tpu.memory_space<smem>>) -> (i32, i32) {
    %c0_i32 = arith.constant 0 : i32
    %c0_i32_0 = arith.constant 0 : i32
    %c0_i32_1 = arith.constant 0 : i32
    return %c0_i32, %c0_i32_0 : i32, i32
  }
  func.func @transform_3(%arg0: i32, %arg1: memref<1xi32, #tpu.memory_space<smem>>) -> (i32, i32) {
    %c0_i32 = arith.constant 0 : i32
    %c0_i32_0 = arith.constant 0 : i32
    %c0_i32_1 = arith.constant 0 : i32
    return %c0_i32, %c0_i32_0 : i32, i32
  }
  func.func @transform_4(%arg0: i32, %arg1: memref<1xi32, #tpu.memory_space<smem>>) -> (i32, i32) {
    %c0_i32 = arith.constant 0 : i32
    %c0_i32_0 = arith.constant 0 : i32
    %c0_i32_1 = arith.constant 0 : i32
    return %c0_i32, %c0_i32_0 : i32, i32
  }
  func.func @transform_5(%arg0: i32, %arg1: memref<1xi32, #tpu.memory_space<smem>>) -> (i32, i32) {
    %c0_i32 = arith.constant 0 : i32
    %c0_i32_0 = arith.constant 0 : i32
    %c0_i32_1 = arith.constant 0 : i32
    return %c0_i32, %c0_i32_0 : i32, i32
  }
  func.func @transform_6(%arg0: i32, %arg1: memref<1xi32, #tpu.memory_space<smem>>) -> (i32, i32) {
    %c0_i32 = arith.constant 0 : i32
    %c0_i32_0 = arith.constant 0 : i32
    %c0_i32_1 = arith.constant 0 : i32
    return %c0_i32, %c0_i32_0 : i32, i32
  }
  func.func @transform_7(%arg0: i32, %arg1: memref<1xi32, #tpu.memory_space<smem>>) -> (i32, i32) {
    %c0_i32 = arith.constant 0 : i32
    %c0_i32_0 = arith.constant 0 : i32
    %c0_i32_1 = arith.constant 0 : i32
    return %c0_i32, %c0_i32_0 : i32, i32
  }
  func.func @transform_8(%arg0: i32, %arg1: memref<1xi32, #tpu.memory_space<smem>>) -> (i32, i32) {
    %c0_i32 = arith.constant 0 : i32
    %c0_i32_0 = arith.constant 0 : i32
    %c0_i32_1 = arith.constant 0 : i32
    return %c0_i32, %c0_i32_0 : i32, i32
  }
}

module attributes {stable_mosaic.version = 11 : i64} {
  func.func @_gather_kernel(%arg0: i32, %arg1: memref<1x128xi32, #tpu.memory_space<vmem>>, %arg2: memref<1x5xf32, #tpu.memory_space<smem>>, %arg3: memref<1x128xf32, #tpu.memory_space<vmem>>) attributes {dimension_semantics = [#tpu.dimension_semantics<parallel>], iteration_bounds = array<i64: 3>, scalar_prefetch = 0 : i64, scratch_operands = 0 : i64, tpu.core_type = #tpu.core_type<tc>, window_params = [{transform_indices = @transform_0, window_bounds = array<i64: 1, 128>}, {transform_indices = @transform_1, window_bounds = array<i64: 1, 5>}, {transform_indices = @transform_2, window_bounds = array<i64: 1, 128>}]} {
    %c0 = arith.constant 0 : index
    %c0_0 = arith.constant 0 : index
    %0 = vector.load %arg1[%c0, %c0_0] : memref<1x128xi32, #tpu.memory_space<vmem>>, vector<1x128xi32>
    %cst = arith.constant 0.000000e+00 : f32
    %1 = vector.broadcast %cst : f32 to vector<1x128xf32>
    %c0_i32 = arith.constant 0 : i32
    %2 = vector.broadcast %c0_i32 : i32 to vector<1x128xi32>
    %3 = arith.cmpi eq, %0, %2 : vector<1x128xi32>
    %c0_1 = arith.constant 0 : index
    %c0_2 = arith.constant 0 : index
    %4 = memref.load %arg2[%c0_1, %c0_2] : memref<1x5xf32, #tpu.memory_space<smem>>
    %5 = vector.broadcast %4 : f32 to vector<1x128xf32>
    %6 = arith.select %3, %5, %1 : vector<1x128xi1>, vector<1x128xf32>
    %c1_i32 = arith.constant 1 : i32
    %7 = vector.broadcast %c1_i32 : i32 to vector<1x128xi32>
    %8 = arith.cmpi eq, %0, %7 : vector<1x128xi32>
    %c0_3 = arith.constant 0 : index
    %c1 = arith.constant 1 : index
    %9 = memref.load %arg2[%c0_3, %c1] : memref<1x5xf32, #tpu.memory_space<smem>>
    %10 = vector.broadcast %9 : f32 to vector<1x128xf32>
    %11 = arith.select %8, %10, %6 : vector<1x128xi1>, vector<1x128xf32>
    %c2_i32 = arith.constant 2 : i32
    %12 = vector.broadcast %c2_i32 : i32 to vector<1x128xi32>
    %13 = arith.cmpi eq, %0, %12 : vector<1x128xi32>
    %c0_4 = arith.constant 0 : index
    %c2 = arith.constant 2 : index
    %14 = memref.load %arg2[%c0_4, %c2] : memref<1x5xf32, #tpu.memory_space<smem>>
    %15 = vector.broadcast %14 : f32 to vector<1x128xf32>
    %16 = arith.select %13, %15, %11 : vector<1x128xi1>, vector<1x128xf32>
    %c3_i32 = arith.constant 3 : i32
    %17 = vector.broadcast %c3_i32 : i32 to vector<1x128xi32>
    %18 = arith.cmpi eq, %0, %17 : vector<1x128xi32>
    %c0_5 = arith.constant 0 : index
    %c3 = arith.constant 3 : index
    %19 = memref.load %arg2[%c0_5, %c3] : memref<1x5xf32, #tpu.memory_space<smem>>
    %20 = vector.broadcast %19 : f32 to vector<1x128xf32>
    %21 = arith.select %18, %20, %16 : vector<1x128xi1>, vector<1x128xf32>
    %c4_i32 = arith.constant 4 : i32
    %22 = vector.broadcast %c4_i32 : i32 to vector<1x128xi32>
    %23 = arith.cmpi eq, %0, %22 : vector<1x128xi32>
    %c0_6 = arith.constant 0 : index
    %c4 = arith.constant 4 : index
    %24 = memref.load %arg2[%c0_6, %c4] : memref<1x5xf32, #tpu.memory_space<smem>>
    %25 = vector.broadcast %24 : f32 to vector<1x128xf32>
    %26 = arith.select %23, %25, %21 : vector<1x128xi1>, vector<1x128xf32>
    %c0_7 = arith.constant 0 : index
    %c0_8 = arith.constant 0 : index
    %27 = vector.load %arg3[%c0_7, %c0_8] : memref<1x128xf32, #tpu.memory_space<vmem>>, vector<1x128xf32>
    tpu.vector_store %arg3[%c0_7, %c0_8], %26 {strides = array<i32>} : memref<1x128xf32, #tpu.memory_space<vmem>>, vector<1x128xf32>,
    return
  }
  func.func @transform_0(%arg0: i32) -> (i32, i32) {
    %c0_i32 = arith.constant 0 : i32
    %c0_i32_0 = arith.constant 0 : i32
    return %c0_i32, %arg0 : i32, i32
  }
  func.func @transform_1(%arg0: i32) -> (i32, i32) {
    %c0_i32 = arith.constant 0 : i32
    %c0_i32_0 = arith.constant 0 : i32
    %c0_i32_1 = arith.constant 0 : i32
    return %c0_i32, %c0_i32_0 : i32, i32
  }
  func.func @transform_2(%arg0: i32) -> (i32, i32) {
    %c0_i32 = arith.constant 0 : i32
    %c0_i32_0 = arith.constant 0 : i32
    return %c0_i32, %arg0 : i32, i32
  }
}

</mosaic_0001>

<bundles_post_ra>
// kernel: rewarder_forward.2
= control target key start
LH: loop header
LB: loop body
LE: loop exit
PB: predicated region body
PF: predicated region fallthrough
CT: control target
= control target key end

     0   :  { %s2359_s0 = inlined_call_operand.<no memory space> [shape: s32[1], index: 0, kind: input, shape index: {}]   ;;  %s2360_s1 = inlined_call_operand.vmem [shape: f32[384,10], index: 1, kind: input, shape index: {}]   ;;  %s2361_s2 = inlined_call_operand.vmem [shape: s32[384,1], index: 2, kind: input, shape index: {}]   ;;  %s2362_s3 = inlined_call_operand.vmem [shape: f32[10,256], index: 3, kind: input, shape index: {}]   ;;  %s2363_s4 = inlined_call_operand.vmem [shape: f32[1,256], index: 4, kind: input, shape index: {}]   ;;  %s2364_s5 = inlined_call_operand.vmem [shape: f32[1,128], index: 5, kind: input, shape index: {}]   ;;  %s2365_s6 = inlined_call_operand.vmem [shape: f32[1,128], index: 6, kind: input, shape index: {}]   ;;  %s2366_s7 = inlined_call_operand.vmem [shape: f32[1,128], index: 7, kind: input, shape index: {}]   ;;  %s2367_s8 = inlined_call_operand.vmem [shape: f32[1,128], index: 8, kind: output, shape index: {0}]   ;;  %s2368_s9 = inlined_call_operand.hbm [shape: f32[1,1], index: 9, kind: output, shape index: {1}]  }
   0x1   :  { %15 = sst [smem:[#allocation4]] %s2359_s0 }
   0x2   :  { %16 = vsyncpa [#allocation6], 0  ;;  %s1873_s11 = smov 0  }
   0x3 LB: > { %s1879_s12 = sadd.s32 4294967295, %s1810_s11   ;;  %p1353_p0 = scmp.ge.s32.totalorder %s1810_s11, 1  ;;  %s1810_s11 = sphi %s1873_s11, %s22_s11  }
   0x4   : > { %p270_p1 = scmp.lt.s32.totalorder %s1810_s11, 4 }
   0x6   : > { %p271_p2 = pnand %p1353_p0, %p270_p1 }
   0x7   : > { %s1354_s13 = sshll.u32 (!%p271_p2), %s1879_s12, 4  ;;  %p1358_p4 = scmp.ne.s32.totalorder (!%p271_p2), %s1879_s12, 0 }
   0x8   : > { %274 = sbr.rel (%p271_p2) target bundleno = 1476 (0x5c4), region = 48  ;;  %p305_p3 = scmp.lt.s32.totalorder (!%p271_p2), %s1354_s13, 47 }
   0xf   : > { %s2370_s13 = smov (!%p305_p3, %s1354_s13), 47  ;;  %319 = sbr.rel (%p1358_p4) target bundleno = 22 (0x16), region = 52 }
  0x10   : > { %s1355_s0 = sshll.u32 %s2370_s13, 3  ;;  %vm321_vm0 = vcmask (!%p1358_p4), 0   ;;  %v1812_v0 = vmov (!%p1358_p4), 0.0   ;;  %v1813_v1 = vmov (!%p1358_p4), -1e+30  }
  0x11   : > { %s1887_s16 = scalar_lea.vmem %s2360_s1, %s1355_s0  ;;  %s1892_s19 = scalar_lea.vmem %s2361_s2, %s1355_s0  ;;  %320 = vst [vmem:[%s2367_s8] sm:$0x1] (!%p1358_p4), %v1812_v0  ;;  %322 = vst.msk [vmem:[#allocation5] sm:$0x1] (!%p1358_p4), %vm321_vm0, %v1812_v0 }
  0x12   : > { %323 = vst.msk [vmem:[#allocation2] sm:$0x1] (!%p1358_p4), %vm321_vm0, %v1813_v1 }
  0x16 PF: > { %v326_v2 = vld [vmem:[%s1892_s19 + $0x10] sm:$0xff]  ;;  %v324_v3 = vld [vmem:[%s1892_s19] sm:$0xff]  ;;  %v327_v4 = vld [vmem:[%s1892_s19 + $0x18] sm:$0xff]  ;;  %v1814_v5 = vmov 0   ;;  %v1815_v9 = vmov 0.0   ;;  %vm551_vm1 = vcmask 1041408   ;;  %v340_v42 = vlaneseq }
  0x17   : > { %1735 = vset.pattern.permute.xlu1 %v1814_v5  ;;  %1734 = vset.pattern.permute.xlu0 %v1814_v5  ;;  %v344_v6 = vadd.s32 5, %v326_v2  ;;  %v342_v7 = vadd.s32 5, %v324_v3  ;;  %v325_v8 = vld [vmem:[%s1892_s19 + $0x8] sm:$0xff]  ;;  %v345_v10 = vadd.s32 5, %v327_v4  ;;  %v328_v13 = vld [vmem:[%s1892_s19 + $0x20] sm:$0xff]  ;;  %v331_v21 = vld [vmem:[%s1892_s19 + $0x38] sm:$0xff] }
  0x18   : > { %622 = vmatprep.mubr.f32.mxu0 %v1815_v9  ;;  %v343_v11 = vadd.s32 5, %v325_v8  ;;  %v329_v12 = vld [vmem:[%s1892_s19 + $0x28] sm:$0xff]  ;;  %v489_v15 = vld [vmem:[%s2362_s3 + $0x18] sm:$0x3]  ;;  %v346_v17 = vadd.s32 5, %v328_v13  ;;  %v486_v19 = vld [vmem:[%s2362_s3] sm:$0xff] }
  0x19   : > { %365 = vperm.xlu1 %1735, %v344_v6   ;;  %359 = vperm.xlu0 %1734, %v342_v7   ;;  %v487_v14 = vld [vmem:[%s2362_s3 + $0x8] sm:$0xff]  ;;  %v347_v16 = vadd.s32 5, %v329_v12  ;;  %v488_v20 = vld [vmem:[%s2362_s3 + $0x10] sm:$0x3]  ;;  %vm1816_vm2 = vmmov 1   ;;  %v349_v24 = vadd.s32 5, %v331_v21 }
  0x1a   : > { %v1608_v18 = vpack.c.bf16 %v489_v15, %v487_v14  ;;  %v330_v22 = vld [vmem:[%s1892_s19 + $0x30] sm:$0xff]  ;;  %vm1609_vm3 = vmpackc.low %vm551_vm1, %vm1816_vm2  ;;  %v1611_v23 = vpack.c.bf16 %v488_v20, %v486_v19  ;;  %v333_v26 = vld [vmem:[%s1892_s19 + $0x48] sm:$0xff]  ;;  %v1928_v43 = vand.u32 127, %v340_v42  ;;  %vm502_vm5 = vcmask 80896   ;;  %s1086_s18 = sld [smem:[#allocation4]]  ;;  %s1819_s20 = smov [#allocation5]  }
  0x1b   : > { %v348_v25 = vadd.s32 5, %v330_v22  ;;  %v332_v27 = vld [vmem:[%s1892_s19 + $0x40] sm:$0xff]  ;;  %v351_v28 = vadd.s32 5, %v333_v26  ;;  %v335_v30 = vld [vmem:[%s1892_s19 + $0x58] sm:$0xff]  ;;  %v334_v31 = vld [vmem:[%s1892_s19 + $0x50] sm:$0xff]  ;;  %s1296_s21 = sshll.u32 %s1819_s20, 4  ;;  %s1297_s21 = int_to_ptr.vmem [resolvable:$true] %s1296_s21 }
  0x1c   : > { %1610 = vmatprep.subr.msk.bf16.mxu0 %vm1609_vm3, %v1608_v18  ;;  %v350_v29 = vadd.s32 5, %v332_v27  ;;  %v353_v32 = vadd.s32 5, %v335_v30  ;;  %v352_v33 = vadd.s32 5, %v334_v31  ;;  %v337_v34 = vld [vmem:[%s1892_s19 + $0x68] sm:$0xff]  ;;  %v336_v35 = vld [vmem:[%s1892_s19 + $0x60] sm:$0xff]  ;;  %v339_v38 = vld [vmem:[%s1892_s19 + $0x78] sm:$0xff]  ;;  %p1781_p9 = scmp.lt.s32.totalorder %s1297_s21, %s1297_s21 }
  0x1d   : > { %368 = vperm.xlu1 %1735, %v345_v10   ;;  %362 = vperm.xlu0 %1734, %v343_v11   ;;  %v355_v36 = vadd.s32 5, %v337_v34  ;;  %v354_v37 = vadd.s32 5, %v336_v35  ;;  %v338_v39 = vld [vmem:[%s1892_s19 + $0x70] sm:$0xff]  ;;  %v357_v40 = vadd.s32 5, %v339_v38  ;;  %v454_v44 = vld [vmem:[%s1887_s16] sm:$0xff]  ;;  %v455_v49 = vld [vmem:[%s1887_s16 + $0x8] sm:$0xff] }
  0x1e   : > { %1613 = vmatpush1.bf16.msk.msra.mxu0 %vm1609_vm3, %v1611_v23  ;;  %v356_v41 = vadd.s32 5, %v338_v39  ;;  %v456_v51 = vld [vmem:[%s1887_s16 + $0x10] sm:$0xff]  ;;  %v457_v58 = vld [vmem:[%s1887_s16 + $0x18] sm:$0xff]  ;;  %v458_v62 = vld [vmem:[%s1887_s16 + $0x20] sm:$0xff]  ;;  %s1395_s19 = sshll.u32 %s1879_s12, 7  ;;  %p1716_p5 = scmp.eq.s32.totalorder %s1879_s12, 2 }
  0x1f   : > { %v459_v2 = vld [vmem:[%s1887_s16 + $0x28] sm:$0xff]  ;;  %v460_v6 = vld [vmem:[%s1887_s16 + $0x30] sm:$0xff]  ;;  %v461_v11 = vld [vmem:[%s1887_s16 + $0x38] sm:$0xff]  ;;  %s1774_s22 = scalar_lea.vmem %s1297_s21, 16  ;;  %s1780_s23 = scalar_lea.vmem %s1297_s21, 32 }
  0x20   : > { %v462_v15 = vld [vmem:[%s1887_s16 + $0x40] sm:$0xff]  ;;  %v463_v19 = vld [vmem:[%s1887_s16 + $0x48] sm:$0xff]  ;;  %v464_v23 = vld [vmem:[%s1887_s16 + $0x50] sm:$0xff]  ;;  %p1775_p6 = scmp.ne.s32.totalorder %s1297_s21, %s1774_s22  ;;  %p1782_p10 = scmp.lt.s32.totalorder %s1780_s23, %s1774_s22 }
  0x21   : > { %374 = vperm.xlu1 %1735, %v347_v16   ;;  %371 = vperm.xlu0 %1734, %v346_v17   ;;  %v465_v27 = vld [vmem:[%s1887_s16 + $0x58] sm:$0xff]  ;;  %v466_v31 = vld [vmem:[%s1887_s16 + $0x60] sm:$0xff]  ;;  %v467_v35 = vld [vmem:[%s1887_s16 + $0x68] sm:$0xff] }
  0x22   : > { %v468_v39 = vld [vmem:[%s1887_s16 + $0x70] sm:$0xff]  ;;  %p1776_p7 = pnand %p1775_p6, %p1716_p5  ;;  %p1783_p11 = por %p1782_p10, %p1781_p9 }
  0x24   : > { %p1777_p8 = pneg %p1776_p7 }
  0x25   : > { %380 = vperm.xlu1 %1735, %v349_v24   ;;  %377 = vperm.xlu0 %1734, %v348_v25  }
  0x26   : > { %p1784_p12 = pnand %p1783_p11, %p1777_p8 }
  0x29   : > { %386 = vperm.xlu1 %1735, %v351_v28   ;;  %383 = vperm.xlu0 %1734, %v350_v29  }
  0x2d   : > { %392 = vperm.xlu1 %1735, %v353_v32   ;;  %389 = vperm.xlu0 %1734, %v352_v33  }
  0x31   : > { %398 = vperm.xlu1 %1735, %v355_v36   ;;  %395 = vperm.xlu0 %1734, %v354_v37  }
  0x35   : > { %404 = vperm.xlu1 %1735, %v357_v40   ;;  %401 = vperm.xlu0 %1734, %v356_v41  }
  0x98   : > { %v360_v45 = vpop.permute.xlu0 %359  ;;  %v366_v46 = vpop.permute.xlu1 %365 }
  0x99   : > { %vm406_vm4 = vcmp.eq.s32.totalorder %v1928_v43, %v360_v45  ;;  %vm408_vm6 = vcmp.eq.s32.totalorder %v1928_v43, %v366_v46 }
  0x9a   : > { %v1359_v47 = vsel %vm406_vm4, 1.0, %v1815_v9  ;;  %v1361_v52 = vsel %vm408_vm6, 1.0, %v1815_v9 }
  0x9b   : > { %v470_v48 = vadd.f32 %v1359_v47, %v454_v44  ;;  %v472_v56 = vadd.f32 %v1361_v52, %v456_v51  ;;  %v469_v44 = vld [vmem:[%s1887_s16 + $0x78] sm:$0xff]  ;;  %v1817_v47 = vmov 0.0|0.0  }
  0x9c   : > { %v363_v50 = vpop.permute.xlu0 %362  ;;  %v369_v55 = vpop.permute.xlu1 %368  ;;  %1638 = vmatprep.subr.bf16.mxu0 %v1817_v47  ;;  %1614 = vmatprep.subr.bf16.mxu1 %v1817_v47 }
  0x9d   : > { %vm407_vm7 = vcmp.eq.s32.totalorder %v1928_v43, %v363_v50  ;;  %1377 = vmatmul.mubr.msk.f32.vlgmr.msra.gmra.mrb[0].mxu0 %vm502_vm5, %v470_v48  ;;  %vm409_vm8 = vcmp.eq.s32.totalorder %v1928_v43, %v369_v55  ;;  %v493_v48 = vshrl.u32 %v340_v42, 7  ;;  %v490_v50 = vld [vmem:[%s2363_s4] sm:$0x3] }
  0x9e   : > { %v1360_v53 = vsel %vm407_vm7, 1.0, %v1815_v9  ;;  %628 = vmatprep.mubr.f32.mxu0 %v1815_v9  ;;  %v1362_v59 = vsel %vm409_vm8, 1.0, %v1815_v9  ;;  %vm1092_vm7 = vcmask 1040384   ;;  %vm1129_vm8 = vcmask 0  }
  0x9f   : > { %v471_v54 = vadd.f32 %v1360_v53, %v455_v49  ;;  %v473_v61 = vadd.f32 %v1362_v59, %v457_v58  ;;  %v2012_v49 = vsub.s32 0, %v493_v48  ;;  %v498_v51 = vsub.s32 1, %v493_v48 }
  0xa0   : > { %v372_v57 = vpop.permute.xlu0 %371  ;;  %v375_v60 = vpop.permute.xlu1 %374 }
  0xa1   : > { %1378 = vmatmul.mubr.msk.f32.gmra.mrb[2].mxu0 %vm502_vm5, %v471_v54  ;;  %vm410_vm9 = vcmp.eq.s32.totalorder %v1928_v43, %v372_v57  ;;  %vm411_vm10 = vcmp.eq.s32.totalorder %v1928_v43, %v375_v60  ;;  %v2018_v52 = vrot.slane %v490_v50, %v2012_v49  ;;  %v2020_v53 = vrot.slane %v490_v50, %v498_v51 }
  0xa2   : > { %634 = vmatprep.mubr.f32.mxu0 %v1815_v9  ;;  %v1363_v63 = vsel %vm410_vm9, 1.0, %v1815_v9  ;;  %v1364_v3 = vsel %vm411_vm10, 1.0, %v1815_v9 }
  0xa3   : > { %v474_v1 = vadd.f32 %v1363_v63, %v458_v62  ;;  %v475_v5 = vadd.f32 %v1364_v3, %v459_v2 }
  0xa4   : > { %v378_v0 = vpop.permute.xlu0 %377  ;;  %v381_v4 = vpop.permute.xlu1 %380 }
  0xa5   : > { %1379 = vmatmul.mubr.msk.f32.gmra.mrb[4].mxu0 %vm502_vm5, %v472_v56  ;;  %vm412_vm11 = vcmp.eq.s32.totalorder %v1928_v43, %v378_v0  ;;  %vm413_vm12 = vcmp.eq.s32.totalorder %v1928_v43, %v381_v4 }
  0xa6   : > { %640 = vmatprep.mubr.f32.mxu0 %v1815_v9  ;;  %v1365_v7 = vsel %vm412_vm11, 1.0, %v1815_v9  ;;  %v1366_v12 = vsel %vm413_vm12, 1.0, %v1815_v9 }
  0xa7   : > { %v476_v10 = vadd.f32 %v1365_v7, %v460_v6  ;;  %v477_v14 = vadd.f32 %v1366_v12, %v461_v11 }
  0xa8   : > { %v384_v8 = vpop.permute.xlu0 %383  ;;  %v387_v13 = vpop.permute.xlu1 %386 }
  0xa9   : > { %1380 = vmatmul.mubr.msk.f32.gmra.mrb[6].mxu0 %vm502_vm5, %v473_v61  ;;  %vm414_vm13 = vcmp.eq.s32.totalorder %v1928_v43, %v384_v8  ;;  %vm415_vm14 = vcmp.eq.s32.totalorder %v1928_v43, %v387_v13 }
  0xaa   : > { %646 = vmatprep.mubr.f32.mxu0 %v1815_v9  ;;  %v1367_v16 = vsel %vm414_vm13, 1.0, %v1815_v9  ;;  %v1368_v20 = vsel %vm415_vm14, 1.0, %v1815_v9 }
  0xab   : > { %v478_v18 = vadd.f32 %v1367_v16, %v462_v15  ;;  %v479_v22 = vadd.f32 %v1368_v20, %v463_v19 }
  0xac   : > { %v390_v17 = vpop.permute.xlu0 %389  ;;  %v393_v21 = vpop.permute.xlu1 %392 }
  0xad   : > { %1381 = vmatmul.mubr.msk.f32.gmra.mrb[8].mxu0 %vm502_vm5, %v474_v1  ;;  %vm416_vm15 = vcmp.eq.s32.totalorder %v1928_v43, %v390_v17  ;;  %vm417_vm0 = vcmp.eq.s32.totalorder %v1928_v43, %v393_v21 }
  0xae   : > { %652 = vmatprep.mubr.f32.mxu0 %v1815_v9  ;;  %v1369_v24 = vsel %vm416_vm15, 1.0, %v1815_v9  ;;  %v1370_v28 = vsel %vm417_vm0, 1.0, %v1815_v9 }
  0xaf   : > { %v480_v26 = vadd.f32 %v1369_v24, %v464_v23  ;;  %v481_v30 = vadd.f32 %v1370_v28, %v465_v27 }
  0xb0   : > { %v396_v25 = vpop.permute.xlu0 %395  ;;  %v399_v29 = vpop.permute.xlu1 %398 }
  0xb1   : > { %1382 = vmatmul.mubr.msk.f32.gmra.mrb[10].mxu0 %vm502_vm5, %v475_v5  ;;  %vm418_vm1 = vcmp.eq.s32.totalorder %v1928_v43, %v396_v25  ;;  %vm419_vm2 = vcmp.eq.s32.totalorder %v1928_v43, %v399_v29 }
  0xb2   : > { %658 = vmatprep.mubr.f32.mxu0 %v1815_v9  ;;  %v1371_v32 = vsel %vm418_vm1, 1.0, %v1815_v9  ;;  %v1372_v36 = vsel %vm419_vm2, 1.0, %v1815_v9 }
  0xb3   : > { %v482_v34 = vadd.f32 %v1371_v32, %v466_v31  ;;  %v483_v38 = vadd.f32 %v1372_v36, %v467_v35 }
  0xb4   : > { %v402_v33 = vpop.permute.xlu0 %401  ;;  %v405_v37 = vpop.permute.xlu1 %404 }
  0xb5   : > { %1383 = vmatmul.mubr.msk.f32.gmra.mrb[12].mxu0 %vm502_vm5, %v476_v10  ;;  %vm420_vm3 = vcmp.eq.s32.totalorder %v1928_v43, %v402_v33  ;;  %vm421_vm4 = vcmp.eq.s32.totalorder %v1928_v43, %v405_v37 }
  0xb6   : > { %664 = vmatprep.mubr.f32.mxu0 %v1815_v9  ;;  %v1373_v40 = vsel %vm420_vm3, 1.0, %v1815_v9  ;;  %v1374_v45 = vsel %vm421_vm4, 1.0, %v1815_v9 }
  0xb7   : > { %v484_v41 = vadd.f32 %v1373_v40, %v468_v39  ;;  %v485_v46 = vadd.f32 %v1374_v45, %v469_v44 }
  0xb9   : > { %1384 = vmatmul.mubr.msk.f32.gmra.mrb[14].mxu0 %vm502_vm5, %v477_v14 }
  0xba   : > { %670 = vmatprep.mubr.f32.mxu0 %v1815_v9 }
  0xbd   : > { %1385 = vmatmul.mubr.msk.f32.gmra.mrb[16].mxu0 %vm502_vm5, %v478_v18 }
  0xbe   : > { %676 = vmatprep.mubr.f32.mxu0 %v1815_v9 }
  0xc1   : > { %1386 = vmatmul.mubr.msk.f32.gmra.mrb[18].mxu0 %vm502_vm5, %v479_v22 }
  0xc2   : > { %682 = vmatprep.mubr.f32.mxu0 %v1815_v9 }
  0xc5   : > { %1387 = vmatmul.mubr.msk.f32.gmra.mrb[20].mxu0 %vm502_vm5, %v480_v26 }
  0xc6   : > { %688 = vmatprep.mubr.f32.mxu0 %v1815_v9 }
  0xc9   : > { %1388 = vmatmul.mubr.msk.f32.gmra.mrb[22].mxu0 %vm502_vm5, %v481_v30 }
  0xca   : > { %694 = vmatprep.mubr.f32.mxu0 %v1815_v9 }
  0xcd   : > { %1389 = vmatmul.mubr.msk.f32.gmra.mrb[24].mxu0 %vm502_vm5, %v482_v34 }
  0xce   : > { %700 = vmatprep.mubr.f32.mxu0 %v1815_v9 }
  0xd1   : > { %1390 = vmatmul.mubr.msk.f32.gmra.mrb[26].mxu0 %vm502_vm5, %v483_v38 }
  0xd2   : > { %706 = vmatprep.mubr.f32.mxu0 %v1815_v9 }
  0xd5   : > { %1391 = vmatmul.mubr.msk.f32.gmra.mrb[28].mxu0 %vm502_vm5, %v484_v41 }
  0xd6   : > { %712 = vmatprep.mubr.f32.mxu0 %v1815_v9 }
  0xd9   : > { %1392 = vmatmul.mubr.msk.f32.gmra.mrb[30].mxu0 %vm502_vm5, %v485_v46  ;;  %vm1818_vm5 = vmmov 0  }
  0xda   : > { %1535 = vmatprep.mubr.msk.f32.mxu0 %vm1818_vm5, %v1815_v9  ;;  %1500 = vmatprep.mubr.msk.f32.mxu1 %vm1818_vm5, %v1815_v9 }
 0x170   : > { %v624_v54 = vpop.f32.mrb[0].mxu0 }
 0x171   : > { %v2023_v55 = vadd.f32 %v624_v54, %v2018_v52  ;;  %v626_v56 = vpop.f32.mrb[1].mxu0 }
 0x172   : > { %v627_v57 = vadd.f32 %v626_v56, %v2020_v53 }
 0x173   : > { %721 = vadd.xlane.f32.xlu0 %v2023_v55 }
 0x174   : > { %v630_v42 = vpop.f32.mrb[2].mxu0 }
 0x175   : > { %v2028_v58 = vadd.f32 %v630_v42, %v2018_v52  ;;  %v632_v59 = vpop.f32.mrb[3].mxu0 }
 0x176   : > { %v633_v60 = vadd.f32 %v632_v59, %v2020_v53 }
 0x177   : > { %723 = vadd.xlane.f32.xlu1 %v2028_v58 }
 0x178   : > { %v2032_v61 = vpack.c.bf16 %v633_v60, %v627_v57  ;;  %v636_v62 = vpop.f32.mrb[4].mxu0 }
 0x179   : > { %v2035_v63 = vadd.f32 %v636_v62, %v2018_v52  ;;  %v638_v0 = vpop.f32.mrb[5].mxu0 }
 0x17a   : > { %v639_v1 = vadd.f32 %v638_v0, %v2020_v53  ;;  %1640 = vmatpush3.bf16.xpose.msra.mxu0 %v2032_v61 }
 0x17b   : > { %725 = vadd.xlane.f32.xlu0 %v2035_v63  ;;  %1641 = vmatprep.subr.bf16.mxu0 %v1817_v47 }
 0x17c   : > { %v642_v2 = vpop.f32.mrb[6].mxu0 }
 0x17d   : > { %v2042_v3 = vadd.f32 %v642_v2, %v2018_v52  ;;  %v644_v4 = vpop.f32.mrb[7].mxu0 }
 0x17e   : > { %v645_v5 = vadd.f32 %v644_v4, %v2020_v53 }
 0x17f   : > { %727 = vadd.xlane.f32.xlu0 %v2042_v3 }
 0x180   : > { %v2046_v6 = vpack.c.bf16 %v645_v5, %v639_v1  ;;  %v648_v7 = vpop.f32.mrb[8].mxu0 }
 0x181   : > { %v2049_v8 = vadd.f32 %v648_v7, %v2018_v52  ;;  %v650_v10 = vpop.f32.mrb[9].mxu0 }
 0x182   : > { %v651_v11 = vadd.f32 %v650_v10, %v2020_v53  ;;  %1643 = vmatpush3.bf16.xpose.msra.mxu0 %v2046_v6 }
 0x183   : > { %729 = vadd.xlane.f32.xlu1 %v2049_v8  ;;  %1644 = vmatprep.subr.bf16.mxu0 %v1817_v47 }
 0x184   : > { %v654_v12 = vpop.f32.mrb[10].mxu0 }
 0x185   : > { %v2056_v13 = vadd.f32 %v654_v12, %v2018_v52  ;;  %v656_v14 = vpop.f32.mrb[11].mxu0 }
 0x186   : > { %v657_v15 = vadd.f32 %v656_v14, %v2020_v53 }
 0x187   : > { %731 = vadd.xlane.f32.xlu0 %v2056_v13 }
 0x188   : > { %v2060_v16 = vpack.c.bf16 %v657_v15, %v651_v11  ;;  %v660_v17 = vpop.f32.mrb[12].mxu0 }
 0x189   : > { %v2063_v18 = vadd.f32 %v660_v17, %v2018_v52  ;;  %v662_v19 = vpop.f32.mrb[13].mxu0 }
 0x18a   : > { %v663_v20 = vadd.f32 %v662_v19, %v2020_v53  ;;  %1646 = vmatpush3.bf16.xpose.msra.mxu0 %v2060_v16 }
 0x18b   : > { %733 = vadd.xlane.f32.xlu1 %v2063_v18  ;;  %1647 = vmatprep.subr.bf16.mxu0 %v1817_v47 }
 0x18c   : > { %v666_v21 = vpop.f32.mrb[14].mxu0 }
 0x18d   : > { %v2070_v22 = vadd.f32 %v666_v21, %v2018_v52  ;;  %v668_v23 = vpop.f32.mrb[15].mxu0 }
 0x18e   : > { %v669_v24 = vadd.f32 %v668_v23, %v2020_v53 }
 0x18f   : > { %735 = vadd.xlane.f32.xlu0 %v2070_v22 }
 0x190   : > { %v2074_v25 = vpack.c.bf16 %v669_v24, %v663_v20  ;;  %v672_v26 = vpop.f32.mrb[16].mxu0 }
 0x191   : > { %v2077_v27 = vadd.f32 %v672_v26, %v2018_v52  ;;  %v674_v28 = vpop.f32.mrb[17].mxu0 }
 0x192   : > { %v675_v29 = vadd.f32 %v674_v28, %v2020_v53  ;;  %1649 = vmatpush3.bf16.xpose.msra.mxu0 %v2074_v25 }
 0x193   : > { %737 = vadd.xlane.f32.xlu1 %v2077_v27  ;;  %1650 = vmatprep.subr.bf16.mxu0 %v1817_v47 }
 0x194   : > { %v678_v30 = vpop.f32.mrb[18].mxu0 }
 0x195   : > { %v2084_v31 = vadd.f32 %v678_v30, %v2018_v52  ;;  %v680_v32 = vpop.f32.mrb[19].mxu0 }
 0x196   : > { %v681_v33 = vadd.f32 %v680_v32, %v2020_v53 }
 0x197   : > { %739 = vadd.xlane.f32.xlu0 %v2084_v31 }
 0x198   : > { %v2088_v34 = vpack.c.bf16 %v681_v33, %v675_v29  ;;  %v684_v35 = vpop.f32.mrb[20].mxu0 }
 0x199   : > { %v2091_v36 = vadd.f32 %v684_v35, %v2018_v52  ;;  %v686_v37 = vpop.f32.mrb[21].mxu0 }
 0x19a   : > { %v687_v38 = vadd.f32 %v686_v37, %v2020_v53  ;;  %1652 = vmatpush3.bf16.xpose.msra.mxu0 %v2088_v34 }
 0x19b   : > { %741 = vadd.xlane.f32.xlu1 %v2091_v36  ;;  %1653 = vmatprep.subr.bf16.mxu0 %v1817_v47 }
 0x19c   : > { %v690_v39 = vpop.f32.mrb[22].mxu0 }
 0x19d   : > { %v2098_v40 = vadd.f32 %v690_v39, %v2018_v52  ;;  %v692_v41 = vpop.f32.mrb[23].mxu0 }
 0x19e   : > { %v693_v44 = vadd.f32 %v692_v41, %v2020_v53 }
 0x19f   : > { %743 = vadd.xlane.f32.xlu0 %v2098_v40 }
 0x1a0   : > { %v2102_v45 = vpack.c.bf16 %v693_v44, %v687_v38  ;;  %v696_v46 = vpop.f32.mrb[24].mxu0 }
 0x1a1   : > { %v2105_v48 = vadd.f32 %v696_v46, %v2018_v52  ;;  %v698_v50 = vpop.f32.mrb[25].mxu0 }
 0x1a2   : > { %v699_v51 = vadd.f32 %v698_v50, %v2020_v53  ;;  %1655 = vmatpush3.bf16.xpose.msra.mxu0 %v2102_v45 }
 0x1a3   : > { %745 = vadd.xlane.f32.xlu1 %v2105_v48  ;;  %1656 = vmatprep.subr.bf16.mxu0 %v1817_v47 }
 0x1a4   : > { %v702_v54 = vpop.f32.mrb[26].mxu0 }
 0x1a5   : > { %v2112_v56 = vadd.f32 %v702_v54, %v2018_v52  ;;  %v704_v57 = vpop.f32.mrb[27].mxu0 }
 0x1a6   : > { %v705_v42 = vadd.f32 %v704_v57, %v2020_v53 }
 0x1a7   : > { %747 = vadd.xlane.f32.xlu0 %v2112_v56 }
 0x1a8   : > { %v2116_v59 = vpack.c.bf16 %v705_v42, %v699_v51  ;;  %v708_v60 = vpop.f32.mrb[28].mxu0 }
 0x1a9   : > { %v2119_v62 = vadd.f32 %v708_v60, %v2018_v52  ;;  %v710_v0 = vpop.f32.mrb[29].mxu0 }
 0x1aa   : > { %v711_v1 = vadd.f32 %v710_v0, %v2020_v53  ;;  %1658 = vmatpush3.bf16.xpose.msra.mxu0 %v2116_v59 }
 0x1ab   : > { %749 = vadd.xlane.f32.xlu1 %v2119_v62  ;;  %1659 = vmatprep.subr.bf16.mxu0 %v1817_v47 }
 0x1ac   : > { %v714_v2 = vpop.f32.mrb[30].mxu0 }
 0x1ad   : > { %v2126_v4 = vadd.f32 %v714_v2, %v2018_v52  ;;  %v716_v5 = vpop.f32.mrb[31].mxu0 }
 0x1ae   : > { %v717_v7 = vadd.f32 %v716_v5, %v2020_v53 }
 0x1af   : > { %751 = vadd.xlane.f32.xlu0 %v2126_v4 }
 0x1b0   : > { %v2130_v10 = vpack.c.bf16 %v717_v7, %v711_v1 }
 0x1b2   : > { %1661 = vmatpush3.bf16.xpose.msra.mxu0 %v2130_v10 }
 0x1b3   : > { %1662 = vmatprep.subr.bf16.mxu0 %v1817_v47 }
 0x200   : > { %v722_v11 = vpop.xlane.xlu0 %721 }
 0x201   : > { %v754_v12 = vmul.f32 0.0078125, %v722_v11 }
 0x203   : > { %v2135_v14 = vsub.f32 %v2023_v55, %v754_v12 }
 0x204   : > { %v724_v15 = vpop.xlane.xlu1 %723 }
 0x205   : > { %v755_v17 = vmul.f32 0.0078125, %v724_v15  ;;  %v786_v52 = vmul.f32 %v2135_v14, %v2135_v14 }
 0x207   : > { %v2140_v53 = vsub.f32 %v2028_v58, %v755_v17  ;;  %802 = vadd.xlane.f32.xlu1 %v786_v52 }
 0x208   : > { %v726_v19 = vpop.xlane.xlu0 %725 }
 0x209   : > { %v756_v20 = vmul.f32 0.0078125, %v726_v19  ;;  %v787_v21 = vmul.f32 %v2140_v53, %v2140_v53 }
 0x20b   : > { %v2145_v23 = vsub.f32 %v2035_v63, %v756_v20  ;;  %804 = vadd.xlane.f32.xlu0 %v787_v21 }
 0x20c   : > { %v728_v55 = vpop.xlane.xlu0 %727 }
 0x20d   : > { %v757_v24 = vmul.f32 0.0078125, %v728_v55  ;;  %v788_v26 = vmul.f32 %v2145_v23, %v2145_v23 }
 0x20f   : > { %v2150_v28 = vsub.f32 %v2042_v3, %v757_v24  ;;  %806 = vadd.xlane.f32.xlu1 %v788_v26 }
 0x210   : > { %v730_v58 = vpop.xlane.xlu1 %729 }
 0x211   : > { %v758_v29 = vmul.f32 0.0078125, %v730_v58  ;;  %v789_v30 = vmul.f32 %v2150_v28, %v2150_v28 }
 0x213   : > { %v2155_v32 = vsub.f32 %v2049_v8, %v758_v29  ;;  %808 = vadd.xlane.f32.xlu0 %v789_v30 }
 0x214   : > { %v732_v63 = vpop.xlane.xlu0 %731 }
 0x215   : > { %v759_v33 = vmul.f32 0.0078125, %v732_v63  ;;  %v790_v35 = vmul.f32 %v2155_v32, %v2155_v32 }
 0x217   : > { %v2160_v37 = vsub.f32 %v2056_v13, %v759_v33  ;;  %810 = vadd.xlane.f32.xlu1 %v790_v35 }
 0x218   : > { %v734_v3 = vpop.xlane.xlu1 %733 }
 0x219   : > { %v760_v38 = vmul.f32 0.0078125, %v734_v3  ;;  %v791_v39 = vmul.f32 %v2160_v37, %v2160_v37 }
 0x21b   : > { %v2165_v41 = vsub.f32 %v2063_v18, %v760_v38  ;;  %812 = vadd.xlane.f32.xlu0 %v791_v39 }
 0x21c   : > { %v736_v8 = vpop.xlane.xlu0 %735 }
 0x21d   : > { %v761_v44 = vmul.f32 0.0078125, %v736_v8  ;;  %v792_v46 = vmul.f32 %v2165_v41, %v2165_v41 }
 0x21f   : > { %v2170_v50 = vsub.f32 %v2070_v22, %v761_v44  ;;  %814 = vadd.xlane.f32.xlu1 %v792_v46 }
 0x220   : > { %v738_v13 = vpop.xlane.xlu1 %737 }
 0x221   : > { %v762_v51 = vmul.f32 0.0078125, %v738_v13  ;;  %v793_v54 = vmul.f32 %v2170_v50, %v2170_v50 }
 0x223   : > { %v2175_v57 = vsub.f32 %v2077_v27, %v762_v51  ;;  %816 = vadd.xlane.f32.xlu0 %v793_v54 }
 0x224   : > { %v740_v18 = vpop.xlane.xlu0 %739 }
 0x225   : > { %v763_v42 = vmul.f32 0.0078125, %v740_v18  ;;  %v794_v60 = vmul.f32 %v2175_v57, %v2175_v57 }
 0x227   : > { %v2180_v0 = vsub.f32 %v2084_v31, %v763_v42  ;;  %818 = vadd.xlane.f32.xlu1 %v794_v60  ;;  %v2197_v31 = vld [vmem:[%s2366_s7] sm:$0x1] }
 0x228   : > { %v742_v22 = vpop.xlane.xlu1 %741  ;;  %1536 = vmatmul.mubr.f32.vlgmr.msra.gmra.mrb[32].mxu0 %v2197_v31 }
 0x229   : > { %v764_v1 = vmul.f32 0.0078125, %v742_v22  ;;  %v795_v2 = vmul.f32 %v2180_v0, %v2180_v0  ;;  %1570 = vmatprep.mubr.msk.f32.mxu0 %vm1818_vm5, %v1815_v9  ;;  %v2230_v22 = vld [vmem:[%s2364_s5] ss:$0 sm:$0xff] }
 0x22b   : > { %v2185_v5 = vsub.f32 %v2091_v36, %v764_v1  ;;  %820 = vadd.xlane.f32.xlu0 %v795_v2 }
 0x22c   : > { %v744_v27 = vpop.xlane.xlu0 %743 }
 0x22d   : > { %v765_v7 = vmul.f32 0.0078125, %v744_v27  ;;  %v796_v11 = vmul.f32 %v2185_v5, %v2185_v5 }
 0x22f   : > { %v2190_v12 = vsub.f32 %v2098_v40, %v765_v7  ;;  %822 = vadd.xlane.f32.xlu1 %v796_v11 }
 0x230   : > { %v746_v36 = vpop.xlane.xlu1 %745 }
 0x231   : > { %v766_v15 = vmul.f32 0.0078125, %v746_v36  ;;  %v797_v40 = vmul.f32 %v2190_v12, %v2190_v12 }
 0x233   : > { %v2207_v17 = vsub.f32 %v2105_v48, %v766_v15  ;;  %824 = vadd.xlane.f32.xlu0 %v797_v40 }
 0x234   : > { %v748_v52 = vpop.xlane.xlu0 %747 }
 0x235   : > { %v767_v19 = vmul.f32 0.0078125, %v748_v52  ;;  %v798_v20 = vmul.f32 %v2207_v17, %v2207_v17 }
 0x237   : > { %v2212_v21 = vsub.f32 %v2112_v56, %v767_v19  ;;  %826 = vadd.xlane.f32.xlu1 %v798_v20 }
 0x238   : > { %v750_v55 = vpop.xlane.xlu1 %749 }
 0x239   : > { %v768_v24 = vmul.f32 0.0078125, %v750_v55  ;;  %v799_v26 = vmul.f32 %v2212_v21, %v2212_v21 }
 0x23b   : > { %v2217_v58 = vsub.f32 %v2119_v62, %v768_v24  ;;  %828 = vadd.xlane.f32.xlu0 %v799_v26 }
 0x23c   : > { %v752_v48 = vpop.xlane.xlu0 %751 }
 0x23d   : > { %v769_v29 = vmul.f32 0.0078125, %v752_v48  ;;  %v800_v30 = vmul.f32 %v2217_v58, %v2217_v58 }
 0x23f   : > { %v2222_v63 = vsub.f32 %v2126_v4, %v769_v29  ;;  %830 = vadd.xlane.f32.xlu1 %v800_v30 }
 0x241   : > { %v801_v56 = vmul.f32 %v2222_v63, %v2222_v63 }
 0x243   : > { %832 = vadd.xlane.f32.xlu0 %v801_v56 }
 0x294   : > { %v803_v33 = vpop.xlane.xlu1 %802 }
 0x295   : > { %v834_v35 = vmul.f32 0.0078125, %v803_v33 }
 0x297   : > { %v850_v3 = vadd.f32 1e-05, %v834_v35 }
 0x298   : > { %v805_v38 = vpop.xlane.xlu0 %804 }
 0x299   : > { %1736 = vrsqrt.f32 %v850_v3  ;;  %v835_v62 = vmul.f32 0.0078125, %v805_v38 }
 0x29b   : > { %v851_v39 = vadd.f32 1e-05, %v835_v62 }
 0x29c   : > { %v807_v8 = vpop.xlane.xlu1 %806 }
 0x29d   : > { %1738 = vrsqrt.f32 %v851_v39  ;;  %v836_v44 = vmul.f32 0.0078125, %v807_v8 }
 0x29f   : > { %v852_v46 = vadd.f32 1e-05, %v836_v44 }
 0x2a0   : > { %v809_v13 = vpop.xlane.xlu0 %808 }
 0x2a1   : > { %1740 = vrsqrt.f32 %v852_v46  ;;  %v837_v4 = vmul.f32 0.0078125, %v809_v13 }
 0x2a3   : > { %v1737_v51 = vpop.eup %1736  ;;  %v853_v54 = vadd.f32 1e-05, %v837_v4 }
 0x2a4   : > { %v811_v18 = vpop.xlane.xlu1 %810  ;;  %v882_v42 = vmul.f32 %v1737_v51, %v2135_v14  ;;  %v2237_v14 = vld [vmem:[%s2365_s6] ss:$0 sm:$0xff] }
 0x2a5   : > { %1742 = vrsqrt.f32 %v853_v54  ;;  %v838_v60 = vmul.f32 0.0078125, %v811_v18 }
 0x2a6   : > { %v904_v11 = vmul.f32 %v2230_v22, %v882_v42 }
 0x2a7   : > { %v1739_v1 = vpop.eup %1738  ;;  %v854_v2 = vadd.f32 1e-05, %v838_v60 }
 0x2a8   : > { %v813_v27 = vpop.xlane.xlu0 %812  ;;  %v883_v7 = vmul.f32 %v1739_v1, %v2140_v53  ;;  %v926_v20 = vadd.f32 %v2237_v14, %v904_v11 }
 0x2a9   : > { %1744 = vrsqrt.f32 %v854_v2  ;;  %v839_v36 = vmul.f32 0.0078125, %v813_v27 }
 0x2aa   : > { %v905_v15 = vmul.f32 %v2230_v22, %v883_v7 }
 0x2ab   : > { %v1741_v40 = vpop.eup %1740  ;;  %v855_v52 = vadd.f32 1e-05, %v839_v36 }
 0x2ac   : > { %v815_v19 = vpop.xlane.xlu1 %814  ;;  %v927_v55 = vadd.f32 %v2237_v14, %v905_v15  ;;  %v884_v53 = vmul.f32 %v1741_v40, %v2145_v23 }
 0x2ad   : > { %1746 = vrsqrt.f32 %v855_v52  ;;  %v840_v24 = vmul.f32 0.0078125, %v815_v19 }
 0x2ae   : > { %v1615_v26 = vpack.c.bf16 %v927_v55, %v926_v20  ;;  %v906_v33 = vmul.f32 %v2230_v22, %v884_v53 }
 0x2af   : > { %v1743_v48 = vpop.eup %1742  ;;  %v856_v29 = vadd.f32 1e-05, %v840_v24 }
 0x2b0   : > { %1616 = vmatpush3.bf16.xpose.msra.mxu1 %v1615_v26  ;;  %1664 = vmatpush3.bf16.msra.mxu0 %v1615_v26  ;;  %v817_v30 = vpop.xlane.xlu0 %816  ;;  %v885_v56 = vmul.f32 %v1743_v48, %v2150_v28  ;;  %v928_v39 = vadd.f32 %v2237_v14, %v906_v33 }
 0x2b1   : > { %1748 = vrsqrt.f32 %v856_v29  ;;  %v841_v35 = vmul.f32 0.0078125, %v817_v30  ;;  %1617 = vmatprep.subr.bf16.mxu1 %v1817_v47  ;;  %1665 = vmatprep.subr.bf16.mxu0 %v1817_v47 }
 0x2b2   : > { %v907_v23 = vmul.f32 %v2230_v22, %v885_v56 }
 0x2b3   : > { %v1745_v3 = vpop.eup %1744  ;;  %v857_v38 = vadd.f32 1e-05, %v841_v35 }
 0x2b4   : > { %v819_v62 = vpop.xlane.xlu1 %818  ;;  %v929_v8 = vadd.f32 %v2237_v14, %v907_v23  ;;  %v886_v44 = vmul.f32 %v1745_v3, %v2155_v32 }
 0x2b5   : > { %1750 = vrsqrt.f32 %v857_v38  ;;  %v842_v28 = vmul.f32 0.0078125, %v819_v62 }
 0x2b6   : > { %v1618_v46 = vpack.c.bf16 %v929_v8, %v928_v39  ;;  %v908_v18 = vmul.f32 %v2230_v22, %v886_v44 }
 0x2b7   : > { %v1747_v13 = vpop.eup %1746  ;;  %v858_v4 = vadd.f32 1e-05, %v842_v28 }
 0x2b8   : > { %1619 = vmatpush3.bf16.xpose.msra.mxu1 %v1618_v46  ;;  %1667 = vmatpush3.bf16.msra.mxu0 %v1618_v46  ;;  %v821_v51 = vpop.xlane.xlu0 %820  ;;  %v887_v54 = vmul.f32 %v1747_v13, %v2160_v37  ;;  %v930_v27 = vadd.f32 %v2237_v14, %v908_v18 }
 0x2b9   : > { %1752 = vrsqrt.f32 %v858_v4  ;;  %v843_v42 = vmul.f32 0.0078125, %v821_v51  ;;  %1620 = vmatprep.subr.bf16.mxu1 %v1817_v47  ;;  %1668 = vmatprep.subr.bf16.mxu0 %v1817_v47 }
 0x2ba   : > { %v909_v32 = vmul.f32 %v2230_v22, %v887_v54 }
 0x2bb   : > { %v1749_v60 = vpop.eup %1748  ;;  %v859_v1 = vadd.f32 1e-05, %v843_v42 }
 0x2bc   : > { %v823_v2 = vpop.xlane.xlu1 %822  ;;  %v931_v7 = vadd.f32 %v2237_v14, %v909_v32  ;;  %v888_v11 = vmul.f32 %v1749_v60, %v2165_v41 }
 0x2bd   : > { %1754 = vrsqrt.f32 %v859_v1  ;;  %v844_v37 = vmul.f32 0.0078125, %v823_v2 }
 0x2be   : > { %v1621_v36 = vpack.c.bf16 %v931_v7, %v930_v27  ;;  %v910_v20 = vmul.f32 %v2230_v22, %v888_v11 }
 0x2bf   : > { %v1751_v15 = vpop.eup %1750  ;;  %v860_v40 = vadd.f32 1e-05, %v844_v37 }
 0x2c0   : > { %1622 = vmatpush3.bf16.xpose.msra.mxu1 %v1621_v36  ;;  %1670 = vmatpush3.bf16.msra.mxu0 %v1621_v36  ;;  %v825_v52 = vpop.xlane.xlu0 %824  ;;  %v889_v19 = vmul.f32 %v1751_v15, %v2170_v50  ;;  %v932_v48 = vadd.f32 %v2237_v14, %v910_v20 }
 0x2c1   : > { %1756 = vrsqrt.f32 %v860_v40  ;;  %v845_v55 = vmul.f32 0.0078125, %v825_v52  ;;  %1623 = vmatprep.subr.bf16.mxu1 %v1817_v47  ;;  %1671 = vmatprep.subr.bf16.mxu0 %v1817_v47 }
 0x2c2   : > { %v911_v41 = vmul.f32 %v2230_v22, %v889_v19 }
 0x2c3   : > { %v1753_v53 = vpop.eup %1752  ;;  %v861_v24 = vadd.f32 1e-05, %v845_v55 }
 0x2c4   : > { %v827_v26 = vpop.xlane.xlu1 %826  ;;  %v933_v29 = vadd.f32 %v2237_v14, %v911_v41  ;;  %v890_v30 = vmul.f32 %v1753_v53, %v2175_v57 }
 0x2c5   : > { %1758 = vrsqrt.f32 %v861_v24  ;;  %v846_v50 = vmul.f32 0.0078125, %v827_v26 }
 0x2c6   : > { %v1624_v56 = vpack.c.bf16 %v933_v29, %v932_v48  ;;  %v912_v38 = vmul.f32 %v2230_v22, %v890_v30 }
 0x2c7   : > { %v1755_v33 = vpop.eup %1754  ;;  %v862_v35 = vadd.f32 1e-05, %v846_v50 }
 0x2c8   : > { %1625 = vmatpush3.bf16.xpose.msra.mxu1 %v1624_v56  ;;  %1673 = vmatpush3.bf16.msra.mxu0 %v1624_v56  ;;  %v829_v23 = vpop.xlane.xlu0 %828  ;;  %v891_v3 = vmul.f32 %v1755_v33, %v2180_v0  ;;  %v934_v28 = vadd.f32 %v2237_v14, %v912_v38 }
 0x2c9   : > { %1760 = vrsqrt.f32 %v862_v35  ;;  %v847_v62 = vmul.f32 0.0078125, %v829_v23  ;;  %1626 = vmatprep.subr.bf16.mxu1 %v1817_v47  ;;  %1674 = vmatprep.subr.bf16.mxu0 %v1817_v47 }
 0x2ca   : > { %v913_v57 = vmul.f32 %v2230_v22, %v891_v3 }
 0x2cb   : > { %v1757_v39 = vpop.eup %1756  ;;  %v863_v8 = vadd.f32 1e-05, %v847_v62 }
 0x2cc   : > { %v831_v44 = vpop.xlane.xlu1 %830  ;;  %v935_v46 = vadd.f32 %v2237_v14, %v913_v57  ;;  %v892_v13 = vmul.f32 %v1757_v39, %v2185_v5 }
 0x2cd   : > { %1762 = vrsqrt.f32 %v863_v8  ;;  %v848_v0 = vmul.f32 0.0078125, %v831_v44 }
 0x2ce   : > { %v1627_v4 = vpack.c.bf16 %v935_v46, %v934_v28  ;;  %v914_v32 = vmul.f32 %v2230_v22, %v892_v13  ;;  %v1119_v46 = vld [vmem:[#allocation5] sm:$0x1] }
 0x2cf   : > { %v1759_v51 = vpop.eup %1758  ;;  %v864_v54 = vadd.f32 1e-05, %v848_v0 }
 0x2d0   : > { %1628 = vmatpush3.bf16.xpose.msra.mxu1 %v1627_v4  ;;  %1676 = vmatpush3.bf16.msra.mxu0 %v1627_v4  ;;  %v833_v18 = vpop.xlane.xlu0 %832  ;;  %v893_v42 = vmul.f32 %v1759_v51, %v2190_v12  ;;  %v936_v27 = vadd.f32 %v2237_v14, %v914_v32 }
 0x2d1   : > { %1764 = vrsqrt.f32 %v864_v54  ;;  %v849_v60 = vmul.f32 0.0078125, %v833_v18  ;;  %1629 = vmatprep.subr.bf16.mxu1 %v1817_v47  ;;  %1677 = vmatprep.subr.bf16.mxu0 %v1817_v47 }
 0x2d2   : > { %v915_v5 = vmul.f32 %v2230_v22, %v893_v42 }
 0x2d3   : > { %v1761_v1 = vpop.eup %1760  ;;  %v865_v2 = vadd.f32 1e-05, %v849_v60 }
 0x2d4   : > { %v937_v7 = vadd.f32 %v2237_v14, %v915_v5  ;;  %v894_v11 = vmul.f32 %v1761_v1, %v2207_v17 }
 0x2d5   : > { %1766 = vrsqrt.f32 %v865_v2 }
 0x2d6   : > { %v1630_v12 = vpack.c.bf16 %v937_v7, %v936_v27  ;;  %v916_v15 = vmul.f32 %v2230_v22, %v894_v11 }
 0x2d7   : > { %v1763_v37 = vpop.eup %1762 }
 0x2d8   : > { %1631 = vmatpush3.bf16.xpose.msra.mxu1 %v1630_v12  ;;  %1679 = vmatpush3.bf16.msra.mxu0 %v1630_v12  ;;  %v895_v36 = vmul.f32 %v1763_v37, %v2212_v21  ;;  %v938_v19 = vadd.f32 %v2237_v14, %v916_v15 }
 0x2d9   : > { %1632 = vmatprep.subr.bf16.mxu1 %v1817_v47  ;;  %1680 = vmatprep.subr.bf16.mxu0 %v1817_v47 }
 0x2da   : > { %v917_v40 = vmul.f32 %v2230_v22, %v895_v36 }
 0x2db   : > { %v1765_v52 = vpop.eup %1764 }
 0x2dc   : > { %v939_v17 = vadd.f32 %v2237_v14, %v917_v40  ;;  %v896_v20 = vmul.f32 %v1765_v52, %v2217_v58 }
 0x2de   : > { %v1633_v55 = vpack.c.bf16 %v939_v17, %v938_v19  ;;  %v918_v53 = vmul.f32 %v2230_v22, %v896_v20 }
 0x2df   : > { %v1767_v41 = vpop.eup %1766 }
 0x2e0   : > { %1634 = vmatpush3.bf16.xpose.msra.mxu1 %v1633_v55  ;;  %1682 = vmatpush3.bf16.msra.mxu0 %v1633_v55  ;;  %v897_v21 = vmul.f32 %v1767_v41, %v2222_v63  ;;  %v940_v26 = vadd.f32 %v2237_v14, %v918_v53 }
 0x2e1   : > { %1635 = vmatprep.subr.bf16.mxu1 %v1817_v47  ;;  %1683 = vmatprep.subr.bf16.mxu0 %v1817_v47 }
 0x2e2   : > { %v919_v24 = vmul.f32 %v2230_v22, %v897_v21  ;;  %v1091_v22 = vld [vmem:[#allocation2] sm:$0x1] }
 0x2e4   : > { %v941_v48 = vadd.f32 %v2237_v14, %v919_v24 }
 0x2e6   : > { %v1636_v29 = vpack.c.bf16 %v941_v48, %v940_v26 }
 0x2e8   : > { %1637 = vmatpush3.bf16.xpose.msra.mxu1 %v1636_v29  ;;  %1685 = vmatpush3.bf16.msra.mxu0 %v1636_v29 }
 0x2e9   : > { %1686 = vmatprep.subr.bf16.mxu1 %v1817_v47 }
 0x2ef   : > { %1501 = vmatmul.mubr.f32.vlgmr.msra.gmra.mrb[0].mxu1 %v2197_v31 }
 0x2f0   : > { %1688 = vmatpush3.bf16.msra.mxu1 %v2032_v61  ;;  %1605 = vmatprep.mubr.msk.f32.mxu1 %vm1818_vm5, %v1815_v9 }
 0x2f1   : > { %1689 = vmatprep.subr.bf16.mxu1 %v1817_v47 }
 0x2f4   : > { %1691 = vmatpush3.bf16.msra.mxu1 %v2046_v6  ;;  %v1084_v6 = vstv %s1395_s19 }
 0x2f5   : > { %1692 = vmatprep.subr.bf16.mxu1 %v1817_v47 }
 0x2f8   : > { %1694 = vmatpush3.bf16.msra.mxu1 %v2060_v16  ;;  %v1085_v16 = vadd.s32 %v1084_v6, %v1928_v43 }
 0x2f9   : > { %1695 = vmatprep.subr.bf16.mxu1 %v1817_v47 }
 0x2fb   : > { %v1079_v9 = vpop.f32.mrb[32].mxu0 }
 0x2fc   : > { %1697 = vmatpush3.bf16.msra.mxu1 %v2074_v25  ;;  %v1537_v61 = vpop.f32.mrb[33].mxu0  ;;  %v1087_v25 = vstv %s1086_s18 }
 0x2fd   : > { %1698 = vmatprep.subr.bf16.mxu1 %v1817_v47  ;;  %vm1088_vm6 = vcmp.lt.s32.totalorder %v1085_v16, %v1087_v25 }
 0x300   : > { %1700 = vmatpush3.bf16.msra.mxu1 %v2088_v34  ;;  %v1090_v34 = vsel %vm1088_vm6, %v1079_v9, -1e+30 }
 0x301   : > { %1701 = vmatprep.subr.bf16.mxu1 %v1817_v47 }
 0x304   : > { %1703 = vmatpush3.bf16.msra.mxu1 %v2102_v45  ;;  %v1096_v45 = vsel %vm1092_vm7, %v1090_v34, -inf }
 0x305   : > { %1704 = vmatprep.subr.bf16.mxu1 %v1817_v47  ;;  %1097 = vmax.xlane.f32.xlu0 %v1096_v45 }
 0x308   : > { %1706 = vmatpush3.bf16.msra.mxu1 %v2116_v59 }
 0x309   : > { %1707 = vmatprep.subr.bf16.mxu1 %v1817_v47 }
 0x30c   : > { %1709 = vmatpush3.bf16.msra.mxu1 %v2130_v10 }
 0x392   : > { %v1098_v47 = vpop.xlane.xlu0 %1097 }
 0x3c2   : > { %v1009_v31 = vpop.f32.mrb[0].mxu1 }
 0x3c3   : > { %v1089_v58 = vsel %vm1088_vm6, %v1009_v31, -1e+30  ;;  %v1502_v63 = vpop.f32.mrb[1].mxu1 }
 0x3c4   : > { %v1093_v59 = vsel %vm1092_vm7, %v1089_v58, -inf }
 0x3c5   : > { %1094 = vmax.xlane.f32.xlu1 %v1093_v59 }
 0x452   : > { %v1095_v10 = vpop.xlane.xlu1 %1094 }
 0x453   : > { %v1099_v14 = vmax.f32 %v1095_v10, %v1098_v47 }
 0x455   : > { %v1100_v30 = vmax.f32 %v1091_v22, %v1099_v14 }
 0x457   : > { %v1101_v43 = vsub.f32 %v1091_v22, %v1100_v30  ;;  %1106 = vperm.xlu1 %1735, %v1100_v30   ;;  %1285 = vst.msk [vmem:[#allocation2] sm:$0x1] %vm1129_vm8, %v1100_v30 }
 0x459   : > { %v1102_v8 = vmul.f32 1.442695, %v1101_v43 }
 0x4d6   : > { %v1107_v50 = vpop.permute.xlu1 %1106 }
 0x4d7   : > { %v1112_v56 = vrot.slane %v1107_v50, %v2012_v49 }
 0x4d9   : > { %v1113_v33 = vsub.f32 %v1089_v58, %v1112_v56  ;;  %v1116_v35 = vsub.f32 %v1090_v34, %v1112_v56 }
 0x4db   : > { %v1114_v23 = vmul.f32 1.442695, %v1113_v33  ;;  %v1117_v3 = vmul.f32 1.442695, %v1116_v35 }
 0x4dd   : > { %1768 = vpow2.f32 %v1114_v23 }
 0x4de   : > { %1770 = vpow2.f32 %v1117_v3 }
 0x4df   : > { %1772 = vpow2.f32 %v1102_v8 }
 0x4e7   : > { %v1769_v38 = vpop.eup %1768 }
 0x4e8   : > { %v1771_v62 = vpop.eup %1770  ;;  %1571 = vmatmul.mubr.f32.vlgmr.msra.gmra.mrb[34].mxu0 %v1769_v38  ;;  %v1121_v57 = vsel %vm1092_vm7, %v1769_v38, 0.0 }
 0x4e9   : > { %1606 = vmatmul.mubr.f32.vlgmr.msra.gmra.mrb[2].mxu1 %v1771_v62  ;;  %1122 = vadd.xlane.f32.xlu0 %v1121_v57  ;;  %v1124_v39 = vsel %vm1092_vm7, %v1771_v62, 0.0  ;;  %v1773_v44 = vpop.eup %1772 }
 0x4ea   : > { %v1120_v0 = vmul.f32 %v1773_v44, %v1119_v46 }
 0x4ed   : > { %1125 = vadd.xlane.f32.xlu0 %v1124_v39 }
 0x503   : > { %1274 = vperm.xlu0 %1734, %v1773_v44  }
 0x576   : > { %v1123_v28 = vpop.xlane.xlu0 %1122 }
 0x57a   : > { %v1126_v13 = vpop.xlane.xlu0 %1125 }
 0x57b   : > { %v1127_v4 = vadd.f32 %v1126_v13, %v1123_v28 }
 0x57d   : > { %v1128_v51 = vadd.f32 %v1127_v4, %v1120_v0 }
 0x57f   : > { %1130 = vst.msk [vmem:[#allocation5] sm:$0x1] %vm1129_vm8, %v1128_v51 }
 0x580   : > { %1787 = shalt.err (!%p1784_p12)
}
 0x581   : > { %s1788_s26 = scalar_lea.hbm %s2368_s9, 16 }
 0x582   : > { %p1789_p13 = scmp.ne.s32.totalorder %s2368_s9, %s1788_s26  ;;  %p1794_p2 = scmp.lt.u32.totalorder %s1788_s26, %s2368_s9 }
 0x584   : > { %p1790_p0 = pnand %p1789_p13, %p1716_p5 }
 0x586   : > { %p1791_p1 = pneg %p1790_p0 }
 0x588   : > { %p1796_p3 = pnand %p1794_p2, %p1791_p1 }
 0x58a   : > { %1799 = shalt.err (!%p1796_p3)
}
 0x58b   : > { %1713 = dma.vmem_to_hbm [thread:$0]  (%p1716_p5), %s1297_s21, 16, %s2368_s9, [#allocation6]   ;;  %v1275_v54 = vpop.permute.xlu0 %1274  ;;  %v1271_v42 = vld [vmem:[%s2367_s8] sm:$0x1] }
 0x58c   : > { %v1280_v18 = vrot.slane %v1275_v54, %v2012_v49 }
 0x58e   : > { %v1281_v1 = vmul.f32 %v1280_v18, %v1271_v42 }
 0x5bb   : > { %v1197_v32 = vpop.f32.mrb[34].mxu0 }
 0x5bc   : > { %v1267_v60 = vpop.f32.mrb[2].mxu1  ;;  %v1572_v5 = vpop.f32.mrb[35].mxu0 }
 0x5bd   : > { %v1710_v2 = vadd.f32 %v1267_v60, %v1197_v32  ;;  %v1607_v27 = vpop.f32.mrb[3].mxu1 }
 0x5bf   : > { %v1711_v7 = vadd.f32 %v1710_v2, %v1281_v1 }
 0x5c1   : > { %1284 = vst [vmem:[%s2367_s8] sm:$0x1] %v1711_v7 }
 0x5c2   : > { %1805 = dma.done.wait (%p1716_p5), [#allocation6], 16  }
 0x5c3   : > { %1807 = vsyncadd (%p1716_p5), [#allocation6], 4294967280 }
 0x5c4 PF: > { %s22_s11 = sadd.s32 1, %s1810_s11  }
 0x5c5   : > { %p19_p4 = scmp.ge.s32.totalorder %s22_s11, 5  }
 0x5c7   :  { %21 = sbr.rel (!%p19_p4) target bundleno = 3 (0x3), region = 90 }
 0x5ce   :  { %1312 = vsyncpa [#allocation6], 1 }
 0x5cf   :  { %1314 = vsyncpa [#allocation6 + $0x1], 1 }

// kernel: rewarder_forward.3
= control target key start
LH: loop header
LB: loop body
LE: loop exit
PB: predicated region body
PF: predicated region fallthrough
CT: control target
= control target key end

     0   :  { %7 = vsyncpa [#allocation3], 0  ;;  %s301_s9 = smov 0   ;;  %s332_s0 = inlined_call_operand.vmem [shape: s32[1,384], index: 0, kind: input, shape index: {}]   ;;  %s333_s1 = inlined_call_operand.vmem [shape: f32[1,5], index: 1, kind: input, shape index: {}]   ;;  %s334_s2 = inlined_call_operand.vmem [shape: f32[1,384], index: 2, kind: output, shape index: {}]  }
   0x1 LB: > { %s226_s10 = sadd.s32 4294967295, %s283_s9   ;;  %p228_p0 = scmp.ge.s32.totalorder %s283_s9, 1  ;;  %s283_s9 = sphi %s301_s9, %s13_s9  }
   0x2   : > { %p91_p1 = scmp.lt.s32.totalorder %s283_s9, 4  ;;  %s104_s13 = sshll.u32 %s333_s1, 4  ;;  %s105_s13 = int_to_ptr.vmem [resolvable:$true] %s104_s13 }
   0x3   : > { %p247_p3 = scmp.eq.s32.totalorder %s226_s10, 0  ;;  %s258_s15 = scalar_lea.vmem %s105_s13, 16 }
   0x4   : > { %p312_p2 = pnand %p228_p0, %p91_p1  ;;  %p259_p6 = scmp.ne.s32.totalorder %s105_s13, %s258_s15 }
   0x5   : > { %p266_p10 = scmp.lt.s32.totalorder %s105_s13, %s105_s13  ;;  %p267_p11 = scmp.lt.s32.totalorder %s258_s15, %s258_s15 }
   0x6   : > { %p243_p4 = pneg %p312_p2 }
   0x7   : > { %p268_p12 = por %p267_p11, %p266_p10 }
   0x8   : > { %p244_p5 = pnand %p247_p3, %p243_p4 }
   0xa   : > { %p260_p7 = pneg %p244_p5 }
   0xc   : > { %p261_p8 = pnand %p260_p7, %p259_p6 }
   0xe   : > { %p262_p9 = pneg %p261_p8 }
  0x10   : > { %p269_p13 = pnand %p268_p12, %p262_p9 }
  0x12   : > { %272 = shalt.err (!%p269_p13)
}
  0x13   : > { %s285_s16 = smov [#allocation2]   ;;  %123 = sbr.rel (%p312_p2) target bundleno = 42 (0x2a), region = 28 }
  0x14   : > { %246 = dma.vmem_to_smem (!%p244_p5), %s105_s13, 16, %s285_s16, [#allocation3]  }
  0x1a   : > { %278 = dma.done.wait (%p247_p3), [#allocation3], 16  }
  0x1b   : > { %280 = vsyncadd (%p247_p3), [#allocation3], 4294967280 }
  0x1c   : > { %129 = sfence }
  0x1d   : > { %p142_p0 = scmp.lt.s32.totalorder %s226_s10, 2  ;;  %s150_s17 = sld [smem:[#allocation2]] }
  0x1e   : > { %s233_s18 = sld [smem:[#allocation2 + $0x1]]  ;;  %s234_s19 = sld [smem:[#allocation2 + $0x2]] }
  0x1f   : > { %s337_s10 = smov (!%p142_p0, %s226_s10), 2  ;;  %s235_s20 = sld [smem:[#allocation2 + $0x3]] }
  0x20   : > { %s236_s21 = sld [smem:[#allocation2 + $0x4]]  ;;  %s144_s24 = scalar_lea.vmem %s332_s0, %s337_s10 }
  0x21   : > { %v148_v0 = vld [vmem:[%s144_s24] sm:$0x1]  ;;  %s147_s27 = scalar_lea.vmem %s334_s2, %s337_s10 }
  0x22   : > { %vm149_vm0 = vcmp.eq.s32.totalorder %v148_v0, 0  ;;  %vm153_vm1 = vcmp.eq.s32.totalorder %v148_v0, 1  ;;  %vm157_vm2 = vcmp.eq.s32.totalorder %v148_v0, 2  ;;  %vm161_vm3 = vcmp.eq.s32.totalorder %v148_v0, 3 }
  0x23   : > { %v151_v1 = vstv %s150_s17  ;;  %vm165_vm4 = vcmp.eq.s32.totalorder %v148_v0, 4 }
  0x24   : > { %v152_v2 = vsel %vm149_vm0, %v151_v1, 0.0  ;;  %v155_v3 = vstv %s233_s18  ;;  %v159_v4 = vstv %s234_s19 }
  0x25   : > { %v156_v5 = vsel %vm153_vm1, %v155_v3, %v152_v2  ;;  %v163_v7 = vstv %s235_s20 }
  0x26   : > { %v160_v6 = vsel %vm157_vm2, %v159_v4, %v156_v5  ;;  %v167_v8 = vstv %s236_s21 }
  0x27   : > { %v164_v9 = vsel %vm161_vm3, %v163_v7, %v160_v6 }
  0x28   : > { %v168_v10 = vsel %vm165_vm4, %v167_v8, %v164_v9 }
  0x29   : > { %169 = vst [vmem:[%s147_s27] sm:$0x1] %v168_v10 }
  0x2a PF: > { %s13_s9 = sadd.s32 1, %s283_s9  }
  0x2b   : > { %p10_p1 = scmp.ge.s32.totalorder %s13_s9, 5  }
  0x2d   :  { %12 = sbr.rel (!%p10_p1) target bundleno = 1 (0x1), region = 63 }
  0x34   :  { %187 = vsyncpa [#allocation3], 1 }
  0x35   :  { %189 = vsyncpa [#allocation3 + $0x1], 1 }

</bundles_post_ra>
